<compile_context>
chip_gen: v7x
topology: tpu7x:2x2x1
jax: 0.10.0
libtpu: 0.0.40
codegen_flags: <defaults>
</compile_context>

<pallas_src>
import jax
import jax.numpy as jnp
from jax.experimental import pallas as pl
from jax.experimental.pallas import tpu as pltpu


# ---------------------------------------------------------------------------
# Kernel: the entire forward pass for one batch tile (transposed layout).
#   x_ref    : (1, T)        input row (batch on lanes)
#   w1_ref   : (64, 1)       fc1 weight column (f32, used on the VPU)
#   b1_ref   : (64, 1)
#   wmid_ref : (6, 64, 64)   fc2..fc7 weights, (out, in) layout, matmul dtype
#   bmid_ref : (6, 64, 1)    fc2..fc7 biases (f32)
#   w8_ref   : (32, 64)      fc8 weight, matmul dtype
#   b8_ref   : (32, 1)
#   w9_ref   : (32, 1)       fc9 weight column (f32, used on the VPU/XLU)
#   b9_ref   : (1, 1)
#   o_ref    : (1, T)        output row
# ---------------------------------------------------------------------------
def _polymodel_kernel(
    x_ref,
    w1_ref, b1_ref,
    wmid_ref, bmid_ref,
    w8_ref, b8_ref,
    w9_ref, b9_ref,
    o_ref,
):
    f32 = jnp.float32

    def mid(h, idx):
        # fc(idx+2): (64,64) @ (64,T) -> (64,T), f32 accumulation on the MXU.
        w = wmid_ref[idx]                        # (64, 64), static index
        b = bmid_ref[idx]                        # (64, 1)
        return jnp.dot(w, h.astype(w.dtype), preferred_element_type=f32) + b

    x = x_ref[...].astype(f32)                   # (1, T)

    # fc1: K=1 matmul done as a VPU broadcast multiply-add (outer product).
    h = jnp.tanh(w1_ref[...].astype(f32) * x + b1_ref[...])   # (64, T)

    y = h
    h = jnp.tanh(mid(h, 0))                      # fc2 + tanh
    h = jnp.tanh(mid(h, 1))                      # fc3 + tanh
    h = mid(h, 2) + y                            # fc4 (no activation) + residual 1
    y = h
    h = jnp.tanh(mid(h, 3))                      # fc5 + tanh
    h = jnp.tanh(mid(h, 4))                      # fc6 + tanh
    h = jnp.tanh(mid(h, 5))                      # fc7 + tanh
    h = jnp.tanh(h + y)                          # residual 2 + tanh

    # fc8: (32,64) @ (64,T) -> (32,T)
    w8 = w8_ref[...]
    h = jnp.tanh(
        jnp.dot(w8, h.astype(w8.dtype), preferred_element_type=f32) + b8_ref[...]
    )

    # fc9: N=1 matmul done as multiply + feature-axis (sublane/XLU) reduce.
    out = jnp.sum(w9_ref[...].astype(f32) * h, axis=0, keepdims=True) + b9_ref[...]

    o_ref[...] = out.astype(o_ref.dtype)         # (1, T), lane-dense store


# ---------------------------------------------------------------------------
# Wrapper
# ---------------------------------------------------------------------------
def polynomial_model_forward(x, params, *, batch_tile=512,
                             matmul_dtype=jnp.bfloat16):
    """x: (B, 1) float32.  params: list of (W, b) with W shaped (in, out)
    (i.e. torch W.T), matching torch.nn.Linear semantics y = x @ W + b."""
    B, F_in = x.shape
    assert F_in == 1
    assert batch_tile % 128 == 0, "batch_tile must be a multiple of 128 (lanes)"

    # Pad the batch to a multiple of batch_tile (wrapper-side, no assert).
    B_pad = ((B + batch_tile - 1) // batch_tile) * batch_tile
    x_row = jnp.pad(x[:, 0], (0, B_pad - B)).reshape(1, B_pad)   # (1, B_pad)

    ws = [w for (w, _) in params]
    bs = [b for (_, b) in params]

    # fc1: (in=1, out=64) -> column (64, 1); stays f32 (VPU op).
    w1 = ws[0].T.astype(jnp.float32)                              # (64, 1)
    b1 = bs[0].reshape(64, 1).astype(jnp.float32)

    # fc2..fc7: stack six (out, in) = (64, 64) weights -> (6, 64, 64).
    wmid = jnp.stack([w.T for w in ws[1:7]]).astype(matmul_dtype)  # (6, 64, 64)
    bmid = jnp.stack([b.reshape(64, 1) for b in bs[1:7]]).astype(jnp.float32)

    # fc8: (64, 32) -> (32, 64)
    w8 = ws[7].T.astype(matmul_dtype)                              # (32, 64)
    b8 = bs[7].reshape(32, 1).astype(jnp.float32)

    # fc9: (in=32, out=1) is already the (32, 1) column we need; stays f32.
    w9 = ws[8].astype(jnp.float32)                                 # (32, 1)
    b9 = bs[8].reshape(1, 1).astype(jnp.float32)

    flat = [w1, b1, wmid, bmid, w8, b8, w9, b9]

    def const_spec(shape):
        return pl.BlockSpec(shape, lambda i, _s=len(shape): (0,) * _s)

    x_spec = pl.BlockSpec((1, batch_tile), lambda i: (0, i))
    out_spec = pl.BlockSpec((1, batch_tile), lambda i: (0, i))
    param_specs = [const_spec(p.shape) for p in flat]

    grid = (B_pad // batch_tile,)

    fn = pl.pallas_call(
        _polymodel_kernel,
        out_shape=jax.ShapeDtypeStruct((1, B_pad), jnp.float32),
        grid_spec=pltpu.PrefetchScalarGridSpec(
            num_scalar_prefetch=0,
            grid=grid,
            in_specs=[x_spec] + param_specs,
            out_specs=out_spec,
        ),
        compiler_params=pltpu.CompilerParams(
            dimension_semantics=("parallel",),
        ),
    )
    out_row = fn(x_row, *flat)                   # (1, B_pad)
    return out_row[0, :B].reshape(B, 1)


# ---------------------------------------------------------------------------
# Deterministic parameter construction (xavier_uniform weights, torch-default
# uniform biases; exact values don't matter, just deterministic).
# ---------------------------------------------------------------------------
def make_params(key):
    dims = [(1, 64), (64, 64), (64, 64), (64, 64), (64, 64),
            (64, 64), (64, 64), (64, 32), (32, 1)]
    params = []
    for (fan_in, fan_out) in dims:
        key, kw, kb = jax.random.split(key, 3)
        bound_w = (6.0 / (fan_in + fan_out)) ** 0.5       # xavier_uniform
        w = jax.random.uniform(kw, (fan_in, fan_out), jnp.float32,
                               minval=-bound_w, maxval=bound_w)
        bound_b = 1.0 / (fan_in ** 0.5)                   # torch Linear bias init
        b = jax.random.uniform(kb, (fan_out,), jnp.float32,
                               minval=-bound_b, maxval=bound_b)
        params.append((w, b))
    return params


# Pure-JAX reference (f32) for correctness checks.
def reference_forward(x, params):
    def lin(h, wb):
        w, b = wb
        return h @ w + b
    h = jnp.tanh(lin(x, params[0]))
    y = h
    h = jnp.tanh(lin(h, params[1]))
    h = jnp.tanh(lin(h, params[2]))
    h = lin(h, params[3]) + y
    y = h
    h = jnp.tanh(lin(h, params[4]))
    h = jnp.tanh(lin(h, params[5]))
    h = jnp.tanh(lin(h, params[6]))
    h = jnp.tanh(h + y)
    h = jnp.tanh(lin(h, params[7]))
    h = lin(h, params[8])
    return h


if __name__ == "__main__":
    key = jax.random.PRNGKey(0)
    kx, kp = jax.random.split(key)

    B = 1024                                  # 2 grid steps at batch_tile=512
    x = jax.random.normal(kx, (B, 1), jnp.float32)
    params = make_params(kp)

    ref = reference_forward(x, params)

    # f32 MXU path: must match the reference tightly.
    out_f32 = polynomial_model_forward(x, params, batch_tile=512,
                                       matmul_dtype=jnp.float32)
    out_f32 = jax.block_until_ready(out_f32)
    assert out_f32.shape == (B, 1)
    assert jnp.allclose(out_f32, ref, atol=1e-5, rtol=1e-5), "f32 mismatch"

    # bf16 MXU path (default, fast on v6e/v7x): loose tolerance vs f32 ref.
    out_bf16 = polynomial_model_forward(x, params, batch_tile=512,
                                        matmul_dtype=jnp.bfloat16)
    out_bf16 = jax.block_until_ready(out_bf16)
    assert out_bf16.shape == (B, 1)
    assert jnp.allclose(out_bf16, ref, atol=5e-2, rtol=5e-2), "bf16 mismatch"

    print("KERNEL_OK")
</pallas_src>

<mosaic_0001>
module attributes {stable_mosaic.version = 11 : i64} {
  func.func @_polymodel_kernel(%arg0: i32, %arg1: memref<1x512xf32, #tpu.memory_space<vmem>>, %arg2: memref<64x1xf32, #tpu.memory_space<vmem>>, %arg3: memref<64x1xf32, #tpu.memory_space<vmem>>, %arg4: memref<6x64x64xf32, #tpu.memory_space<vmem>>, %arg5: memref<6x64x1xf32, #tpu.memory_space<vmem>>, %arg6: memref<32x64xf32, #tpu.memory_space<vmem>>, %arg7: memref<32x1xf32, #tpu.memory_space<vmem>>, %arg8: memref<32x1xf32, #tpu.memory_space<vmem>>, %arg9: memref<1x1xf32, #tpu.memory_space<vmem>>, %arg10: memref<1x512xf32, #tpu.memory_space<vmem>>) attributes {dimension_semantics = [#tpu.dimension_semantics<parallel>], iteration_bounds = array<i64: 2>, scalar_prefetch = 0 : i64, scratch_operands = 0 : i64, tpu.core_type = #tpu.core_type<tc>, window_params = [{transform_indices = @transform_0, window_bounds = array<i64: 1, 512>}, {pipeline_mode = #tpu.pipeline_mode<synchronous>, transform_indices = @transform_1, window_bounds = array<i64: 64, 1>}, {pipeline_mode = #tpu.pipeline_mode<synchronous>, transform_indices = @transform_2, window_bounds = array<i64: 64, 1>}, {pipeline_mode = #tpu.pipeline_mode<synchronous>, transform_indices = @transform_3, window_bounds = array<i64: 6, 64, 64>}, {pipeline_mode = #tpu.pipeline_mode<synchronous>, transform_indices = @transform_4, window_bounds = array<i64: 6, 64, 1>}, {pipeline_mode = #tpu.pipeline_mode<synchronous>, transform_indices = @transform_5, window_bounds = array<i64: 32, 64>}, {pipeline_mode = #tpu.pipeline_mode<synchronous>, transform_indices = @transform_6, window_bounds = array<i64: 32, 1>}, {pipeline_mode = #tpu.pipeline_mode<synchronous>, transform_indices = @transform_7, window_bounds = array<i64: 32, 1>}, {pipeline_mode = #tpu.pipeline_mode<synchronous>, transform_indices = @transform_8, window_bounds = array<i64: 1, 1>}, {transform_indices = @transform_9, window_bounds = array<i64: 1, 512>}]} {
    %c0 = arith.constant 0 : index
    %c0_0 = arith.constant 0 : index
    %0 = vector.load %arg1[%c0, %c0_0] : memref<1x512xf32, #tpu.memory_space<vmem>>, vector<1x512xf32>
    %c0_1 = arith.constant 0 : index
    %c0_2 = arith.constant 0 : index
    %1 = vector.load %arg2[%c0_1, %c0_2] : memref<64x1xf32, #tpu.memory_space<vmem>>, vector<64x1xf32>
    %2 = vector.broadcast %1 : vector<64x1xf32> to vector<64x512xf32>
    %3 = vector.broadcast %0 : vector<1x512xf32> to vector<64x512xf32>
    %4 = arith.mulf %2, %3 : vector<64x512xf32>
    %c0_3 = arith.constant 0 : index
    %c0_4 = arith.constant 0 : index
    %5 = vector.load %arg3[%c0_3, %c0_4] : memref<64x1xf32, #tpu.memory_space<vmem>>, vector<64x1xf32>
    %6 = vector.broadcast %5 : vector<64x1xf32> to vector<64x512xf32>
    %7 = arith.addf %4, %6 : vector<64x512xf32>
    %8 = math.tanh %7 : vector<64x512xf32>
    %c0_5 = arith.constant 0 : index
    %c0_6 = arith.constant 0 : index
    %c0_7 = arith.constant 0 : index
    %9 = vector.load %arg4[%c0_5, %c0_6, %c0_7] : memref<6x64x64xf32, #tpu.memory_space<vmem>>, vector<1x64x64xf32>
    %10 = vector.shape_cast %9 : vector<1x64x64xf32> to vector<64x64xf32>
    %c0_8 = arith.constant 0 : index
    %c0_9 = arith.constant 0 : index
    %c0_10 = arith.constant 0 : index
    %11 = vector.load %arg5[%c0_8, %c0_9, %c0_10] : memref<6x64x1xf32, #tpu.memory_space<vmem>>, vector<1x64x1xf32>
    %12 = vector.shape_cast %11 : vector<1x64x1xf32> to vector<64x1xf32>
    %cst = arith.constant dense<0.000000e+00> : vector<64x512xf32>
    %13 = tpu.matmul %10, %8, %cst {dimension_numbers = #tpu.dot_dimension_numbers<[1], [0], [0], [1], [0, 0, 1, 1], [], []>} : vector<64x64xf32>, vector<64x512xf32>, vector<64x512xf32> -> vector<64x512xf32>
    %14 = vector.broadcast %12 : vector<64x1xf32> to vector<64x512xf32>
    %15 = arith.addf %13, %14 : vector<64x512xf32>
    %16 = math.tanh %15 : vector<64x512xf32>
    %c1 = arith.constant 1 : index
    %c0_11 = arith.constant 0 : index
    %c0_12 = arith.constant 0 : index
    %17 = vector.load %arg4[%c1, %c0_11, %c0_12] : memref<6x64x64xf32, #tpu.memory_space<vmem>>, vector<1x64x64xf32>
    %18 = vector.shape_cast %17 : vector<1x64x64xf32> to vector<64x64xf32>
    %c1_13 = arith.constant 1 : index
    %c0_14 = arith.constant 0 : index
    %c0_15 = arith.constant 0 : index
    %19 = vector.load %arg5[%c1_13, %c0_14, %c0_15] : memref<6x64x1xf32, #tpu.memory_space<vmem>>, vector<1x64x1xf32>
    %20 = vector.shape_cast %19 : vector<1x64x1xf32> to vector<64x1xf32>
    %cst_16 = arith.constant dense<0.000000e+00> : vector<64x512xf32>
    %21 = tpu.matmul %18, %16, %cst_16 {dimension_numbers = #tpu.dot_dimension_numbers<[1], [0], [0], [1], [0, 0, 1, 1], [], []>} : vector<64x64xf32>, vector<64x512xf32>, vector<64x512xf32> -> vector<64x512xf32>
    %22 = vector.broadcast %20 : vector<64x1xf32> to vector<64x512xf32>
    %23 = arith.addf %21, %22 : vector<64x512xf32>
    %24 = math.tanh %23 : vector<64x512xf32>
    %c2 = arith.constant 2 : index
    %c0_17 = arith.constant 0 : index
    %c0_18 = arith.constant 0 : index
    %25 = vector.load %arg4[%c2, %c0_17, %c0_18] : memref<6x64x64xf32, #tpu.memory_space<vmem>>, vector<1x64x64xf32>
    %26 = vector.shape_cast %25 : vector<1x64x64xf32> to vector<64x64xf32>
    %c2_19 = arith.constant 2 : index
    %c0_20 = arith.constant 0 : index
    %c0_21 = arith.constant 0 : index
    %27 = vector.load %arg5[%c2_19, %c0_20, %c0_21] : memref<6x64x1xf32, #tpu.memory_space<vmem>>, vector<1x64x1xf32>
    %28 = vector.shape_cast %27 : vector<1x64x1xf32> to vector<64x1xf32>
    %cst_22 = arith.constant dense<0.000000e+00> : vector<64x512xf32>
    %29 = tpu.matmul %26, %24, %cst_22 {dimension_numbers = #tpu.dot_dimension_numbers<[1], [0], [0], [1], [0, 0, 1, 1], [], []>} : vector<64x64xf32>, vector<64x512xf32>, vector<64x512xf32> -> vector<64x512xf32>
    %30 = vector.broadcast %28 : vector<64x1xf32> to vector<64x512xf32>
    %31 = arith.addf %29, %30 : vector<64x512xf32>
    %32 = arith.addf %31, %8 : vector<64x512xf32>
    %c3 = arith.constant 3 : index
    %c0_23 = arith.constant 0 : index
    %c0_24 = arith.constant 0 : index
    %33 = vector.load %arg4[%c3, %c0_23, %c0_24] : memref<6x64x64xf32, #tpu.memory_space<vmem>>, vector<1x64x64xf32>
    %34 = vector.shape_cast %33 : vector<1x64x64xf32> to vector<64x64xf32>
    %c3_25 = arith.constant 3 : index
    %c0_26 = arith.constant 0 : index
    %c0_27 = arith.constant 0 : index
    %35 = vector.load %arg5[%c3_25, %c0_26, %c0_27] : memref<6x64x1xf32, #tpu.memory_space<vmem>>, vector<1x64x1xf32>
    %36 = vector.shape_cast %35 : vector<1x64x1xf32> to vector<64x1xf32>
    %cst_28 = arith.constant dense<0.000000e+00> : vector<64x512xf32>
    %37 = tpu.matmul %34, %32, %cst_28 {dimension_numbers = #tpu.dot_dimension_numbers<[1], [0], [0], [1], [0, 0, 1, 1], [], []>} : vector<64x64xf32>, vector<64x512xf32>, vector<64x512xf32> -> vector<64x512xf32>
    %38 = vector.broadcast %36 : vector<64x1xf32> to vector<64x512xf32>
    %39 = arith.addf %37, %38 : vector<64x512xf32>
    %40 = math.tanh %39 : vector<64x512xf32>
    %c4 = arith.constant 4 : index
    %c0_29 = arith.constant 0 : index
    %c0_30 = arith.constant 0 : index
    %41 = vector.load %arg4[%c4, %c0_29, %c0_30] : memref<6x64x64xf32, #tpu.memory_space<vmem>>, vector<1x64x64xf32>
    %42 = vector.shape_cast %41 : vector<1x64x64xf32> to vector<64x64xf32>
    %c4_31 = arith.constant 4 : index
    %c0_32 = arith.constant 0 : index
    %c0_33 = arith.constant 0 : index
    %43 = vector.load %arg5[%c4_31, %c0_32, %c0_33] : memref<6x64x1xf32, #tpu.memory_space<vmem>>, vector<1x64x1xf32>
    %44 = vector.shape_cast %43 : vector<1x64x1xf32> to vector<64x1xf32>
    %cst_34 = arith.constant dense<0.000000e+00> : vector<64x512xf32>
    %45 = tpu.matmul %42, %40, %cst_34 {dimension_numbers = #tpu.dot_dimension_numbers<[1], [0], [0], [1], [0, 0, 1, 1], [], []>} : vector<64x64xf32>, vector<64x512xf32>, vector<64x512xf32> -> vector<64x512xf32>
    %46 = vector.broadcast %44 : vector<64x1xf32> to vector<64x512xf32>
    %47 = arith.addf %45, %46 : vector<64x512xf32>
    %48 = math.tanh %47 : vector<64x512xf32>
    %c5 = arith.constant 5 : index
    %c0_35 = arith.constant 0 : index
    %c0_36 = arith.constant 0 : index
    %49 = vector.load %arg4[%c5, %c0_35, %c0_36] : memref<6x64x64xf32, #tpu.memory_space<vmem>>, vector<1x64x64xf32>
    %50 = vector.shape_cast %49 : vector<1x64x64xf32> to vector<64x64xf32>
    %c5_37 = arith.constant 5 : index
    %c0_38 = arith.constant 0 : index
    %c0_39 = arith.constant 0 : index
    %51 = vector.load %arg5[%c5_37, %c0_38, %c0_39] : memref<6x64x1xf32, #tpu.memory_space<vmem>>, vector<1x64x1xf32>
    %52 = vector.shape_cast %51 : vector<1x64x1xf32> to vector<64x1xf32>
    %cst_40 = arith.constant dense<0.000000e+00> : vector<64x512xf32>
    %53 = tpu.matmul %50, %48, %cst_40 {dimension_numbers = #tpu.dot_dimension_numbers<[1], [0], [0], [1], [0, 0, 1, 1], [], []>} : vector<64x64xf32>, vector<64x512xf32>, vector<64x512xf32> -> vector<64x512xf32>
    %54 = vector.broadcast %52 : vector<64x1xf32> to vector<64x512xf32>
    %55 = arith.addf %53, %54 : vector<64x512xf32>
    %56 = math.tanh %55 : vector<64x512xf32>
    %57 = arith.addf %56, %32 : vector<64x512xf32>
    %58 = math.tanh %57 : vector<64x512xf32>
    %c0_41 = arith.constant 0 : index
    %c0_42 = arith.constant 0 : index
    %59 = vector.load %arg6[%c0_41, %c0_42] : memref<32x64xf32, #tpu.memory_space<vmem>>, vector<32x64xf32>
    %cst_43 = arith.constant dense<0.000000e+00> : vector<32x512xf32>
    %60 = tpu.matmul %59, %58, %cst_43 {dimension_numbers = #tpu.dot_dimension_numbers<[1], [0], [0], [1], [0, 0, 1, 1], [], []>} : vector<32x64xf32>, vector<64x512xf32>, vector<32x512xf32> -> vector<32x512xf32>
    %c0_44 = arith.constant 0 : index
    %c0_45 = arith.constant 0 : index
    %61 = vector.load %arg7[%c0_44, %c0_45] : memref<32x1xf32, #tpu.memory_space<vmem>>, vector<32x1xf32>
    %62 = vector.broadcast %61 : vector<32x1xf32> to vector<32x512xf32>
    %63 = arith.addf %60, %62 : vector<32x512xf32>
    %64 = math.tanh %63 : vector<32x512xf32>
    %c0_46 = arith.constant 0 : index
    %c0_47 = arith.constant 0 : index
    %65 = vector.load %arg8[%c0_46, %c0_47] : memref<32x1xf32, #tpu.memory_space<vmem>>, vector<32x1xf32>
    %66 = vector.broadcast %65 : vector<32x1xf32> to vector<32x512xf32>
    %67 = arith.mulf %66, %64 : vector<32x512xf32>
    %cst_48 = arith.constant dense<0.000000e+00> : vector<512xf32>
    %68 = vector.multi_reduction <add>, %67, %cst_48 [0] : vector<32x512xf32> to vector<512xf32>
    %69 = vector.shape_cast %68 : vector<512xf32> to vector<1x512xf32>
    %c0_49 = arith.constant 0 : index
    %c0_50 = arith.constant 0 : index
    %70 = vector.load %arg9[%c0_49, %c0_50] : memref<1x1xf32, #tpu.memory_space<vmem>>, vector<1x1xf32>
    %71 = vector.broadcast %70 : vector<1x1xf32> to vector<1x512xf32>
    %72 = arith.addf %69, %71 : vector<1x512xf32>
    %c0_51 = arith.constant 0 : index
    %c0_52 = arith.constant 0 : index
    %73 = vector.load %arg10[%c0_51, %c0_52] : memref<1x512xf32, #tpu.memory_space<vmem>>, vector<1x512xf32>
    tpu.vector_store %arg10[%c0_51, %c0_52], %72 {strides = array<i32>} : memref<1x512xf32, #tpu.memory_space<vmem>>, vector<1x512xf32>,
    return
  }
  func.func @transform_0(%arg0: i32) -> (i32, i32) {
    %c0_i32 = arith.constant 0 : i32
    %c0_i32_0 = arith.constant 0 : i32
    return %c0_i32, %arg0 : i32, i32
  }
  func.func @transform_1(%arg0: i32) -> (i32, i32) {
    %c0_i32 = arith.constant 0 : i32
    %c0_i32_0 = arith.constant 0 : i32
    %c0_i32_1 = arith.constant 0 : i32
    return %c0_i32, %c0_i32_0 : i32, i32
  }
  func.func @transform_2(%arg0: i32) -> (i32, i32) {
    %c0_i32 = arith.constant 0 : i32
    %c0_i32_0 = arith.constant 0 : i32
    %c0_i32_1 = arith.constant 0 : i32
    return %c0_i32, %c0_i32_0 : i32, i32
  }
  func.func @transform_3(%arg0: i32) -> (i32, i32, i32) {
    %c0_i32 = arith.constant 0 : i32
    %c0_i32_0 = arith.constant 0 : i32
    %c0_i32_1 = arith.constant 0 : i32
    %c0_i32_2 = arith.constant 0 : i32
    return %c0_i32, %c0_i32_0, %c0_i32_1 : i32, i32, i32
  }
  func.func @transform_4(%arg0: i32) -> (i32, i32, i32) {
    %c0_i32 = arith.constant 0 : i32
    %c0_i32_0 = arith.constant 0 : i32
    %c0_i32_1 = arith.constant 0 : i32
    %c0_i32_2 = arith.constant 0 : i32
    return %c0_i32, %c0_i32_0, %c0_i32_1 : i32, i32, i32
  }
  func.func @transform_5(%arg0: i32) -> (i32, i32) {
    %c0_i32 = arith.constant 0 : i32
    %c0_i32_0 = arith.constant 0 : i32
    %c0_i32_1 = arith.constant 0 : i32
    return %c0_i32, %c0_i32_0 : i32, i32
  }
  func.func @transform_6(%arg0: i32) -> (i32, i32) {
    %c0_i32 = arith.constant 0 : i32
    %c0_i32_0 = arith.constant 0 : i32
    %c0_i32_1 = arith.constant 0 : i32
    return %c0_i32, %c0_i32_0 : i32, i32
  }
  func.func @transform_7(%arg0: i32) -> (i32, i32) {
    %c0_i32 = arith.constant 0 : i32
    %c0_i32_0 = arith.constant 0 : i32
    %c0_i32_1 = arith.constant 0 : i32
    return %c0_i32, %c0_i32_0 : i32, i32
  }
  func.func @transform_8(%arg0: i32) -> (i32, i32) {
    %c0_i32 = arith.constant 0 : i32
    %c0_i32_0 = arith.constant 0 : i32
    %c0_i32_1 = arith.constant 0 : i32
    return %c0_i32, %c0_i32_0 : i32, i32
  }
  func.func @transform_9(%arg0: i32) -> (i32, i32) {
    %c0_i32 = arith.constant 0 : i32
    %c0_i32_0 = arith.constant 0 : i32
    return %c0_i32, %arg0 : i32, i32
  }
}

</mosaic_0001>

<bundles_post_ra>
// kernel: tpu_custom_call.1
= control target key start
LH: loop header
LB: loop body
LE: loop exit
PB: predicated region body
PF: predicated region fallthrough
CT: control target
= control target key end

     0   :  { %s5168_s0 = inlined_call_operand.vmem [shape: f32[1,1024], index: 0, kind: input, shape index: {}]   ;;  %s5169_s1 = inlined_call_operand.vmem [shape: f32[64,1], index: 1, kind: input, shape index: {}]   ;;  %s5170_s2 = inlined_call_operand.vmem [shape: f32[64,1], index: 2, kind: input, shape index: {}]   ;;  %s5171_s3 = inlined_call_operand.vmem [shape: f32[6,64,64], index: 3, kind: input, shape index: {}]   ;;  %s5172_s4 = inlined_call_operand.vmem [shape: f32[6,64,1], index: 4, kind: input, shape index: {}]   ;;  %s5173_s5 = inlined_call_operand.vmem [shape: f32[32,64], index: 5, kind: input, shape index: {}]   ;;  %s5174_s6 = inlined_call_operand.vmem [shape: f32[32,1], index: 6, kind: input, shape index: {}]   ;;  %s5175_s7 = inlined_call_operand.vmem [shape: f32[32,1], index: 7, kind: input, shape index: {}]   ;;  %s5176_s8 = inlined_call_operand.<no memory space> [shape: f32[1,1], index: 8, kind: input, shape index: {}]   ;;  %s5177_s9 = inlined_call_operand.hbm [shape: f32[1,1024], index: 9, kind: output, shape index: {}]  }
   0x1   :  { %v14_v0 = vstv %s5176_s8 }
   0x2   :  { %15 = vst [vmem:[#allocation2] sm:$0x1] %v14_v0 }
   0x3   :  { %16 = vsyncpa [#allocation4], 0 }
   0x4   :  { %18 = vsyncpa [#allocation4 + $0x1], 0  ;;  %s4144_s11 = smov 0   ;;  %s4146_s12 = smov 0  }
   0x5   :  { %s4148_s13 = smov 0   ;;  %s4150_s14 = smov 0  }
   0x6 LB: > { %s4165_s8 = sadd.s32 4294967295, %s4085_s14   ;;  %s3079_s15 = sadd.s32 4294967294, %s4085_s14   ;;  %s4085_s14 = sphi %s4150_s14, %s5183_s14   ;;  %s4081_s13 = sphi %s4148_s13, %s5182_s13   ;;  %s4077_s12 = sphi %s4146_s12, %s5181_s12   ;;  %s4073_s11 = sphi %s4144_s11, %s5180_s11  }
   0x7   : > { %s4169_s16 = sadd.s32 1, %s4085_s14   ;;  %s225_s17 = sadd.s32 1, %s4081_s13 }
   0x8   : > { %s222_s18 = ssub.s32 %s4085_s14, %s4169_s16  ;;  %p235_p0 = scmp.ne.s32.totalorder %s4081_s13, %s4077_s12 }
   0x9   : > { %p223_p1 = scmp.eq.s32.totalorder %s222_s18, 0  ;;  %p236_p2 = scmp.eq.s32.totalorder %s4165_s8, 1 }
   0xa   : > { %p241_p3 = scmp.ne.s32.totalorder %s4077_s12, %s4073_s11  ;;  %p242_p4 = scmp.eq.s32.totalorder %s3079_s15, 1 }
   0xb   : > { %s4180_s19 = scalar_select %p223_p1, %s4081_s13, %s225_s17  }
   0xc   : > { %p4182_p5 = por %p236_p2, %p235_p0  ;;  %p4186_p6 = por %p242_p4, %p241_p3 }
   0xd   : > { %p3082_p7 = scmp.ge.s32.totalorder %s4085_s14, 1  ;;  %p292_p8 = scmp.lt.s32.totalorder %s4085_s14, 3 }
   0xf   : > { %p293_p9 = pnand %p3082_p7, %p292_p8 }
  0x10   : > { %v435_v1 = vld [vmem:[%s5170_s2] sm:$0xff] (!%p293_p9)  ;;  %v4087_v3 = vmov (!%p293_p9), 0   ;;  %v436_v4 = vld [vmem:[%s5170_s2 + $0x8] sm:$0xff] (!%p293_p9)  ;;  %v337_v6 = vld [vmem:[%s5169_s1 + $0x18] sm:$0xff] (!%p293_p9)  ;;  %v4088_v32 = vmov (!%p293_p9), 0.0   ;;  %s3084_s30 = sshll.u32 (!%p293_p9), %s4165_s8, 2  ;;  %v383_v61 = vlaneseq (!%p293_p9) }
  0x11   : > { %296 = sbr.rel (%p293_p9) target bundleno = 2076 (0x81c), region = 56  ;;  %v334_v2 = vld [vmem:[%s5169_s1] sm:$0xff] (!%p293_p9)  ;;  %3542 = vset.pattern.permute.xlu1 (!%p293_p9), %v4087_v3  ;;  %3541 = vset.pattern.permute.xlu0 (!%p293_p9), %v4087_v3  ;;  %v335_v5 = vld [vmem:[%s5169_s1 + $0x8] sm:$0xff] (!%p293_p9)  ;;  %v336_v7 = vld [vmem:[%s5169_s1 + $0x10] sm:$0xff] (!%p293_p9)  ;;  %p328_p10 = scmp.lt.s32.totalorder (!%p293_p9), %s3084_s30, 7  ;;  %vm603_vm0 = vcmask (!%p293_p9), 523264  }
  0x12   : > { %445 = vperm.xlu1 (!%p293_p9), %3542, %v435_v1   ;;  %344 = vperm.xlu0 (!%p293_p9), %3541, %v334_v2   ;;  %v438_v8 = vld [vmem:[%s5170_s2 + $0x18] sm:$0xff] (!%p293_p9)  ;;  %v437_v9 = vld [vmem:[%s5170_s2 + $0x10] sm:$0xff] (!%p293_p9)  ;;  %v339_v10 = vld [vmem:[%s5169_s1 + $0x28] sm:$0xff] (!%p293_p9)  ;;  %v4376_v0 = vshrl.u32 (!%p293_p9), %v383_v61, 7  ;;  %s324_s27 = sand.u32 (!%p293_p9), 1, %s4077_s12   ;;  %s3274_s29 = sshll.u32 (!%p293_p9), %s4165_s8, 6 }
  0x13   : > { %v338_v11 = vld [vmem:[%s5169_s1 + $0x20] sm:$0xff] (!%p293_p9)  ;;  %v440_v12 = vld [vmem:[%s5170_s2 + $0x28] sm:$0xff] (!%p293_p9)  ;;  %v341_v14 = vld [vmem:[%s5169_s1 + $0x38] sm:$0xff] (!%p293_p9)  ;;  %692 = vmatprep.mubr.f32.mxu0 (!%p293_p9), %v4088_v32  ;;  %805 = vmatprep.mubr.f32.mxu1 (!%p293_p9), %v4088_v32  ;;  %s3083_s28 = sshll.u32 (!%p293_p9), %s324_s27, 2  ;;  %vm3005_vm1 = vcmp.lt.s32.totalorder (!%p293_p9), %v383_v61, 512  ;;  %s5126_s22 = scalar_lea.hbm (!%p293_p9), %s5177_s9, %s3274_s29 }
  0x14   : > { %v439_v13 = vld [vmem:[%s5170_s2 + $0x20] sm:$0xff] (!%p293_p9)  ;;  %v340_v15 = vld [vmem:[%s5169_s1 + $0x30] sm:$0xff] (!%p293_p9)  ;;  %v442_v16 = vld [vmem:[%s5170_s2 + $0x38] sm:$0xff] (!%p293_p9)  ;;  %v385_v3 = vsub.s32 (!%p293_p9), 0, %v4376_v0  ;;  %s326_s10 = scalar_lea.vmem (!%p293_p9), [#allocation3], %s3083_s28  ;;  %s3009_s23 = scalar_lea.sflag (!%p293_p9), [#allocation4], %s324_s27 }
  0x15   : > { %v441_v17 = vld [vmem:[%s5170_s2 + $0x30] sm:$0xff] (!%p293_p9)  ;;  %v556_v18 = vld [vmem:[%s5172_s4 + $0x8] sm:$0xff] (!%p293_p9)  ;;  %v555_v19 = vld [vmem:[%s5172_s4] sm:$0xff] (!%p293_p9)  ;;  %s3023_s15 = sshll.u32 (!%p293_p9), %s326_s10, 4  ;;  %s4090_s8 = smov (!%p293_p9), [#allocation3]   ;;  %s5128_s15 = int_to_ptr.vmem [resolvable:$true] %s3023_s15 }
  0x16   : > { %450 = vperm.xlu1 (!%p293_p9), %3542, %v436_v4   ;;  %349 = vperm.xlu0 (!%p293_p9), %3541, %v335_v5   ;;  %v558_v20 = vld [vmem:[%s5172_s4 + $0x18] sm:$0xff] (!%p293_p9)  ;;  %v557_v21 = vld [vmem:[%s5172_s4 + $0x10] sm:$0xff] (!%p293_p9)  ;;  %v560_v22 = vld [vmem:[%s5172_s4 + $0x28] sm:$0xff] (!%p293_p9)  ;;  %v389_v4 = vsub.s32 (!%p293_p9), 1, %v4376_v0  ;;  %v393_v5 = vsub.s32 (!%p293_p9), 2, %v4376_v0  ;;  %s4023_s24 = scalar_lea.vmem (!%p293_p9), %s5128_s15, 64 }
  0x17   : > { %v559_v23 = vld [vmem:[%s5172_s4 + $0x20] sm:$0xff] (!%p293_p9)  ;;  %v562_v24 = vld [vmem:[%s5172_s4 + $0x38] sm:$0xff] (!%p293_p9)  ;;  %v561_v25 = vld [vmem:[%s5172_s4 + $0x30] sm:$0xff] (!%p293_p9)  ;;  %p4024_p11 = scmp.ne.s32.totalorder (!%p293_p9), %s5128_s15, %s4023_s24 }
  0x18   : > { %v3110_v26 = vld [vmem:[%s5172_s4 + $0x48] sm:$0xff]  ;;  %v3109_v27 = vld [vmem:[%s5172_s4 + $0x40] sm:$0xff]  ;;  %v3112_v28 = vld [vmem:[%s5172_s4 + $0x58] sm:$0xff]  ;;  %s5185_s30 = smov (!%p328_p10, %s3084_s30), 7 }
  0x19   : > { %v3111_v29 = vld [vmem:[%s5172_s4 + $0x50] sm:$0xff]  ;;  %v3114_v30 = vld [vmem:[%s5172_s4 + $0x68] sm:$0xff]  ;;  %v3113_v31 = vld [vmem:[%s5172_s4 + $0x60] sm:$0xff]  ;;  %s330_s17 = scalar_lea.vmem %s5168_s0, %s5185_s30  ;;  %p4025_p12 = pnand %p4024_p11, %p4182_p5 }
  0x1a   : > { %359 = vperm.xlu1 %3542, %v337_v6   ;;  %354 = vperm.xlu0 %3541, %v336_v7   ;;  %v3116_v33 = vld [vmem:[%s5172_s4 + $0x78] sm:$0xff]  ;;  %v3115_v34 = vld [vmem:[%s5172_s4 + $0x70] sm:$0xff]  ;;  %v3142_v35 = vld [vmem:[%s5172_s4 + $0x88] sm:$0xff]  ;;  %v397_v6 = vsub.s32 3, %v4376_v0  ;;  %s4027_s30 = sshll.u32 %s4090_s8, 4  ;;  %s4028_s30 = int_to_ptr.vmem [resolvable:$false] %s4027_s30 }
  0x1b   : > { %v3141_v36 = vld [vmem:[%s5172_s4 + $0x80] sm:$0xff]  ;;  %v3144_v37 = vld [vmem:[%s5172_s4 + $0x98] sm:$0xff]  ;;  %v3143_v38 = vld [vmem:[%s5172_s4 + $0x90] sm:$0xff]  ;;  %p4026_p13 = pneg %p4025_p12  ;;  %s4029_s25 = scalar_lea.vmem %s4028_s30, 128 }
  0x1c   : > { %v3146_v39 = vld [vmem:[%s5172_s4 + $0xa8] sm:$0xff]  ;;  %v3145_v40 = vld [vmem:[%s5172_s4 + $0xa0] sm:$0xff]  ;;  %v3148_v41 = vld [vmem:[%s5172_s4 + $0xb8] sm:$0xff]  ;;  %p4030_p0 = scmp.lt.s32.totalorder %s5128_s15, %s4028_s30  ;;  %p4031_p1 = scmp.lt.s32.totalorder %s4029_s25, %s4023_s24 }
  0x1d   : > { %v3147_v42 = vld [vmem:[%s5172_s4 + $0xb0] sm:$0xff]  ;;  %v3174_v43 = vld [vmem:[%s5172_s4 + $0xc8] sm:$0xff]  ;;  %v3173_v44 = vld [vmem:[%s5172_s4 + $0xc0] sm:$0xff] }
  0x1e   : > { %460 = vperm.xlu1 %3542, %v438_v8   ;;  %455 = vperm.xlu0 %3541, %v437_v9   ;;  %v3176_v45 = vld [vmem:[%s5172_s4 + $0xd8] sm:$0xff]  ;;  %v3175_v46 = vld [vmem:[%s5172_s4 + $0xd0] sm:$0xff]  ;;  %v3178_v47 = vld [vmem:[%s5172_s4 + $0xe8] sm:$0xff]  ;;  %p4032_p2 = por %p4031_p1, %p4030_p0 }
  0x1f   : > { %v3177_v48 = vld [vmem:[%s5172_s4 + $0xe0] sm:$0xff]  ;;  %v3180_v49 = vld [vmem:[%s5172_s4 + $0xf8] sm:$0xff]  ;;  %v3179_v50 = vld [vmem:[%s5172_s4 + $0xf0] sm:$0xff] }
  0x20   : > { %v3206_v51 = vld [vmem:[%s5172_s4 + $0x108] sm:$0xff]  ;;  %v3205_v52 = vld [vmem:[%s5172_s4 + $0x100] sm:$0xff]  ;;  %v3208_v53 = vld [vmem:[%s5172_s4 + $0x118] sm:$0xff]  ;;  %p4033_p3 = pnand %p4032_p2, %p4026_p13 }
  0x21   : > { %v3207_v54 = vld [vmem:[%s5172_s4 + $0x110] sm:$0xff]  ;;  %v3210_v55 = vld [vmem:[%s5172_s4 + $0x128] sm:$0xff]  ;;  %v3209_v56 = vld [vmem:[%s5172_s4 + $0x120] sm:$0xff] }
  0x22   : > { %369 = vperm.xlu1 %3542, %v339_v10   ;;  %364 = vperm.xlu0 %3541, %v338_v11   ;;  %v3212_v57 = vld [vmem:[%s5172_s4 + $0x138] sm:$0xff]  ;;  %v3211_v58 = vld [vmem:[%s5172_s4 + $0x130] sm:$0xff]  ;;  %v3238_v59 = vld [vmem:[%s5172_s4 + $0x148] sm:$0xff] }
  0x23   : > { %v3237_v60 = vld [vmem:[%s5172_s4 + $0x140] sm:$0xff]  ;;  %v3240_v62 = vld [vmem:[%s5172_s4 + $0x158] sm:$0xff]  ;;  %v3239_v63 = vld [vmem:[%s5172_s4 + $0x150] sm:$0xff] }
  0x24   : > { %v3242_v1 = vld [vmem:[%s5172_s4 + $0x168] sm:$0xff]  ;;  %v3241_v2 = vld [vmem:[%s5172_s4 + $0x160] sm:$0xff]  ;;  %v3244_v8 = vld [vmem:[%s5172_s4 + $0x178] sm:$0xff] }
  0x25   : > { %v333_v7 = vld [vmem:[%s330_s17] sm:$0xf]  ;;  %v3243_v9 = vld [vmem:[%s5172_s4 + $0x170] sm:$0xff] }
  0x26   : > { %470 = vperm.xlu1 %3542, %v440_v12   ;;  %465 = vperm.xlu0 %3541, %v439_v13   ;;  %v4399_v10 = vrot.slane %v333_v7, %v385_v3  ;;  %v4401_v11 = vrot.slane %v333_v7, %v389_v4  ;;  %v4403_v12 = vrot.slane %v333_v7, %v393_v5 }
  0x27   : > { %v4405_v13 = vrot.slane %v333_v7, %v397_v6 }
  0x2a   : > { %379 = vperm.xlu1 %3542, %v341_v14   ;;  %374 = vperm.xlu0 %3541, %v340_v15   ;;  %v2655_v14 = vld [vmem:[%s5174_s6 + $0x8] sm:$0xff]  ;;  %v2654_v15 = vld [vmem:[%s5174_s6] sm:$0xff] }
  0x2e   : > { %480 = vperm.xlu1 %3542, %v442_v16   ;;  %475 = vperm.xlu0 %3541, %v441_v17  }
  0x32   : > { %570 = vperm.xlu1 %3542, %v556_v18   ;;  %565 = vperm.xlu0 %3541, %v555_v19  }
  0x36   : > { %580 = vperm.xlu1 %3542, %v558_v20   ;;  %575 = vperm.xlu0 %3541, %v557_v21  }
  0x3a   : > { %590 = vperm.xlu1 %3542, %v560_v22   ;;  %585 = vperm.xlu0 %3541, %v559_v23   ;;  %v2657_v22 = vld [vmem:[%s5174_s6 + $0x18] sm:$0xff] }
  0x3e   : > { %600 = vperm.xlu1 %3542, %v562_v24   ;;  %595 = vperm.xlu0 %3541, %v561_v25  }
  0x42   : > { %911 = vperm.xlu1 %3542, %v3110_v26   ;;  %906 = vperm.xlu0 %3541, %v3109_v27   ;;  %v2656_v26 = vld [vmem:[%s5174_s6 + $0x10] sm:$0xff] }
  0x46   : > { %921 = vperm.xlu1 %3542, %v3112_v28   ;;  %916 = vperm.xlu0 %3541, %v3111_v29  }
  0x4a   : > { %931 = vperm.xlu1 %3542, %v3114_v30   ;;  %926 = vperm.xlu0 %3541, %v3113_v31  }
  0x4e   : > { %941 = vperm.xlu1 %3542, %v3116_v33   ;;  %936 = vperm.xlu0 %3541, %v3115_v34  }
  0x52   : > { %1251 = vperm.xlu1 %3542, %v3142_v35   ;;  %1246 = vperm.xlu0 %3541, %v3141_v36   ;;  %v2885_v35 = vld [vmem:[%s5175_s7 + $0x8] sm:$0xff] }
  0x56   : > { %1261 = vperm.xlu1 %3542, %v3144_v37   ;;  %1256 = vperm.xlu0 %3541, %v3143_v38  }
  0x5a   : > { %1271 = vperm.xlu1 %3542, %v3146_v39   ;;  %1266 = vperm.xlu0 %3541, %v3145_v40   ;;  %v2884_v39 = vld [vmem:[%s5175_s7] sm:$0xff] }
  0x5e   : > { %1281 = vperm.xlu1 %3542, %v3148_v41   ;;  %1276 = vperm.xlu0 %3541, %v3147_v42  }
  0x62   : > { %1591 = vperm.xlu1 %3542, %v3174_v43   ;;  %1586 = vperm.xlu0 %3541, %v3173_v44   ;;  %v2887_v43 = vld [vmem:[%s5175_s7 + $0x18] sm:$0xff] }
  0x66   : > { %1601 = vperm.xlu1 %3542, %v3176_v45   ;;  %1596 = vperm.xlu0 %3541, %v3175_v46  }
  0x6a   : > { %1611 = vperm.xlu1 %3542, %v3178_v47   ;;  %1606 = vperm.xlu0 %3541, %v3177_v48   ;;  %v2886_v47 = vld [vmem:[%s5175_s7 + $0x10] sm:$0xff] }
  0x6e   : > { %1621 = vperm.xlu1 %3542, %v3180_v49   ;;  %1616 = vperm.xlu0 %3541, %v3179_v50  }
  0x72   : > { %1931 = vperm.xlu1 %3542, %v3206_v51   ;;  %1926 = vperm.xlu0 %3541, %v3205_v52  }
  0x76   : > { %1941 = vperm.xlu1 %3542, %v3208_v53   ;;  %1936 = vperm.xlu0 %3541, %v3207_v54  }
  0x7a   : > { %1951 = vperm.xlu1 %3542, %v3210_v55   ;;  %1946 = vperm.xlu0 %3541, %v3209_v56  }
  0x7e   : > { %1961 = vperm.xlu1 %3542, %v3212_v57   ;;  %1956 = vperm.xlu0 %3541, %v3211_v58  }
  0x82   : > { %2271 = vperm.xlu1 %3542, %v3238_v59   ;;  %2266 = vperm.xlu0 %3541, %v3237_v60   ;;  %v2960_v60 = vld [vmem:[#allocation2] sm:$0x1] }
  0x86   : > { %2281 = vperm.xlu1 %3542, %v3240_v62   ;;  %2276 = vperm.xlu0 %3541, %v3239_v63  }
  0x8a   : > { %2291 = vperm.xlu1 %3542, %v3242_v1   ;;  %2286 = vperm.xlu0 %3541, %v3241_v2  }
  0x8e   : > { %2301 = vperm.xlu1 %3542, %v3244_v8   ;;  %2296 = vperm.xlu0 %3541, %v3243_v9  }
  0x91   : > { %v446_v16 = vpop.permute.xlu1 %445  ;;  %v345_v17 = vpop.permute.xlu0 %344 }
  0x92   : > { %v403_v18 = vmul.f32 %v4399_v10, %v345_v17  ;;  %v404_v19 = vmul.f32 %v4401_v11, %v345_v17  ;;  %v405_v20 = vmul.f32 %v4403_v12, %v345_v17  ;;  %v406_v21 = vmul.f32 %v4405_v13, %v345_v17  ;;  %2665 = vperm.xlu1 %3542, %v2655_v14  }
  0x93   : > { %2660 = vperm.xlu0 %3541, %v2654_v15  }
  0x94   : > { %v483_v23 = vadd.f32 %v446_v16, %v403_v18  ;;  %v484_v24 = vadd.f32 %v446_v16, %v404_v19  ;;  %v485_v25 = vadd.f32 %v446_v16, %v405_v20  ;;  %v486_v27 = vadd.f32 %v446_v16, %v406_v21 }
  0x95   : > { %v451_v28 = vpop.permute.xlu1 %450  ;;  %v350_v29 = vpop.permute.xlu0 %349 }
  0x96   : > { %3543 = vtanh.f32 %v483_v23  ;;  %v407_v30 = vmul.f32 %v4399_v10, %v350_v29  ;;  %v408_v31 = vmul.f32 %v4401_v11, %v350_v29  ;;  %v409_v33 = vmul.f32 %v4403_v12, %v350_v29  ;;  %2675 = vperm.xlu1 %3542, %v2657_v22  }
  0x97   : > { %3545 = vtanh.f32 %v484_v24  ;;  %v410_v34 = vmul.f32 %v4405_v13, %v350_v29  ;;  %2670 = vperm.xlu0 %3541, %v2656_v26  }
  0x98   : > { %3547 = vtanh.f32 %v485_v25  ;;  %v487_v36 = vadd.f32 %v451_v28, %v407_v30  ;;  %v488_v37 = vadd.f32 %v451_v28, %v408_v31  ;;  %v489_v38 = vadd.f32 %v451_v28, %v409_v33 }
  0x99   : > { %3549 = vtanh.f32 %v486_v27  ;;  %v490_v40 = vadd.f32 %v451_v28, %v410_v34  ;;  %v360_v41 = vpop.permute.xlu1 %359  ;;  %v355_v42 = vpop.permute.xlu0 %354 }
  0x9a   : > { %3551 = vtanh.f32 %v487_v36  ;;  %2895 = vperm.xlu1 %3542, %v2885_v35   ;;  %v415_v44 = vmul.f32 %v4399_v10, %v360_v41  ;;  %v416_v45 = vmul.f32 %v4401_v11, %v360_v41  ;;  %v417_v46 = vmul.f32 %v4403_v12, %v360_v41 }
  0x9b   : > { %3553 = vtanh.f32 %v488_v37  ;;  %2890 = vperm.xlu0 %3541, %v2884_v39   ;;  %v418_v48 = vmul.f32 %v4405_v13, %v360_v41  ;;  %v411_v51 = vmul.f32 %v4399_v10, %v355_v42  ;;  %v412_v55 = vmul.f32 %v4401_v11, %v355_v42 }
  0x9c   : > { %3555 = vtanh.f32 %v489_v38  ;;  %v413_v58 = vmul.f32 %v4403_v12, %v355_v42  ;;  %v414_v63 = vmul.f32 %v4405_v13, %v355_v42 }
  0x9d   : > { %3557 = vtanh.f32 %v490_v40  ;;  %v461_v49 = vpop.permute.xlu1 %460  ;;  %v456_v50 = vpop.permute.xlu0 %455 }
  0x9e   : > { %v495_v52 = vadd.f32 %v461_v49, %v415_v44  ;;  %v496_v53 = vadd.f32 %v461_v49, %v416_v45  ;;  %v497_v54 = vadd.f32 %v461_v49, %v417_v46  ;;  %2905 = vperm.xlu1 %3542, %v2887_v43   ;;  %v498_v56 = vadd.f32 %v461_v49, %v418_v48 }
  0x9f   : > { %2900 = vperm.xlu0 %3541, %v2886_v47   ;;  %v491_v59 = vadd.f32 %v456_v50, %v411_v51  ;;  %v492_v1 = vadd.f32 %v456_v50, %v412_v55  ;;  %v493_v6 = vadd.f32 %v456_v50, %v413_v58  ;;  %v494_v8 = vadd.f32 %v456_v50, %v414_v63 }
  0xa0   : > { %v4445_v57 = vpop.eup %3543  ;;  %3559 = vtanh.f32 %v495_v52 }
  0xa1   : > { %v4448_v62 = vpop.eup %3545  ;;  %3561 = vtanh.f32 %v496_v53  ;;  %v370_v2 = vpop.permute.xlu1 %369 }
  0xa2   : > { %v365_v4 = vpop.permute.xlu0 %364  ;;  %v4451_v5 = vpop.eup %3547  ;;  %3563 = vtanh.f32 %v497_v54  ;;  %v423_v14 = vmul.f32 %v4399_v10, %v370_v2  ;;  %v424_v15 = vmul.f32 %v4401_v11, %v370_v2  ;;  %v425_v16 = vmul.f32 %v4403_v12, %v370_v2 }
  0xa3   : > { %v4453_v7 = vpop.eup %3549  ;;  %3565 = vtanh.f32 %v498_v56  ;;  %2963 = vperm.xlu0 %3541, %v2960_v60   ;;  %v426_v18 = vmul.f32 %v4405_v13, %v370_v2  ;;  %v419_v19 = vmul.f32 %v4399_v10, %v365_v4  ;;  %v420_v20 = vmul.f32 %v4401_v11, %v365_v4 }
  0xa4   : > { %v4455_v9 = vpop.eup %3551  ;;  %3567 = vtanh.f32 %v491_v59  ;;  %v421_v28 = vmul.f32 %v4403_v12, %v365_v4  ;;  %v422_v31 = vmul.f32 %v4405_v13, %v365_v4 }
  0xa5   : > { %v4460_v17 = vpop.eup %3553  ;;  %3569 = vtanh.f32 %v492_v1  ;;  %v471_v21 = vpop.permute.xlu1 %470  ;;  %v3277_v30 = vpack.c.bf16 %v4455_v9, %v4445_v57 }
  0xa6   : > { %v466_v22 = vpop.permute.xlu0 %465  ;;  %v4465_v23 = vpop.eup %3555  ;;  %3571 = vtanh.f32 %v493_v6  ;;  %v503_v24 = vadd.f32 %v471_v21, %v423_v14  ;;  %v504_v25 = vadd.f32 %v471_v21, %v424_v15  ;;  %v505_v26 = vadd.f32 %v471_v21, %v425_v16 }
  0xa7   : > { %v4467_v27 = vpop.eup %3557  ;;  %3573 = vtanh.f32 %v494_v8  ;;  %v506_v29 = vadd.f32 %v471_v21, %v426_v18  ;;  %v499_v33 = vadd.f32 %v466_v22, %v419_v19  ;;  %v3275_v34 = vpack.c.bf16 %v4460_v17, %v4448_v62 }
  0xa8   : > { %3575 = vtanh.f32 %v503_v24  ;;  %v500_v35 = vadd.f32 %v466_v22, %v420_v20  ;;  %v3291_v36 = vpack.c.bf16 %v4467_v27, %v4453_v7  ;;  %v3293_v37 = vpack.c.bf16 %v4465_v23, %v4451_v5 }
  0xa9   : > { %3577 = vtanh.f32 %v504_v25  ;;  %v380_v38 = vpop.permute.xlu1 %379  ;;  %v501_v41 = vadd.f32 %v466_v22, %v421_v28  ;;  %3276 = vmatprep.subr.bf16.mxu0 %v3275_v34  ;;  %v502_v43 = vadd.f32 %v466_v22, %v422_v31 }
  0xaa   : > { %v375_v39 = vpop.permute.xlu0 %374  ;;  %v4479_v40 = vpop.eup %3559  ;;  %3579 = vtanh.f32 %v505_v26  ;;  %3292 = vmatprep.subr.bf16.mxu1 %v3291_v36  ;;  %3278 = vmatpush1.bf16.msra.mxu0 %v3277_v30  ;;  %v431_v45 = vmul.f32 %v4399_v10, %v380_v38  ;;  %v432_v46 = vmul.f32 %v4401_v11, %v380_v38  ;;  %v433_v47 = vmul.f32 %v4403_v12, %v380_v38 }
  0xab   : > { %v4481_v42 = vpop.eup %3561  ;;  %3581 = vtanh.f32 %v506_v29  ;;  %3294 = vmatpush1.bf16.msra.mxu1 %v3293_v37  ;;  %v434_v49 = vmul.f32 %v4405_v13, %v380_v38  ;;  %v427_v50 = vmul.f32 %v4399_v10, %v375_v39  ;;  %v428_v59 = vmul.f32 %v4401_v11, %v375_v39 }
  0xac   : > { %v4483_v44 = vpop.eup %3563  ;;  %3583 = vtanh.f32 %v499_v33  ;;  %v429_v60 = vmul.f32 %v4403_v12, %v375_v39  ;;  %v430_v10 = vmul.f32 %v4405_v13, %v375_v39 }
  0xad   : > { %v4488_v48 = vpop.eup %3565  ;;  %3585 = vtanh.f32 %v500_v35  ;;  %v481_v51 = vpop.permute.xlu1 %480 }
  0xae   : > { %v476_v52 = vpop.permute.xlu0 %475  ;;  %v4492_v53 = vpop.eup %3567  ;;  %3587 = vtanh.f32 %v501_v41  ;;  %v511_v54 = vadd.f32 %v481_v51, %v431_v45  ;;  %v512_v55 = vadd.f32 %v481_v51, %v432_v46  ;;  %v513_v56 = vadd.f32 %v481_v51, %v433_v47  ;;  %v547_v47 = vld [vmem:[%s5171_s3] sm:$0xff] }
  0xaf   : > { %v4494_v58 = vpop.eup %3569  ;;  %3589 = vtanh.f32 %v502_v43  ;;  %v514_v63 = vadd.f32 %v481_v51, %v434_v49  ;;  %v507_v2 = vadd.f32 %v476_v52, %v427_v50  ;;  %v508_v8 = vadd.f32 %v476_v52, %v428_v59  ;;  %v548_v49 = vld [vmem:[%s5171_s3 + $0x8] sm:$0xff]  ;;  %v549_v50 = vld [vmem:[%s5171_s3 + $0x10] sm:$0xff]  ;;  %v550_v51 = vld [vmem:[%s5171_s3 + $0x18] sm:$0xff] }
  0xb0   : > { %v4498_v1 = vpop.eup %3571  ;;  %3591 = vtanh.f32 %v511_v54  ;;  %v3279_v4 = vpack.c.bf16 %v4481_v42, %v4494_v58  ;;  %v3281_v14 = vpack.c.bf16 %v4479_v40, %v4492_v53  ;;  %v509_v15 = vadd.f32 %v476_v52, %v429_v60  ;;  %v552_v54 = vld [vmem:[%s5171_s3 + $0x28] sm:$0xff] }
  0xb1   : > { %v4503_v6 = vpop.eup %3573  ;;  %3593 = vtanh.f32 %v512_v55  ;;  %v3297_v11 = vpack.c.bf16 %v4483_v44, %v4498_v1  ;;  %v510_v18 = vadd.f32 %v476_v52, %v430_v10  ;;  %v551_v52 = vld [vmem:[%s5171_s3 + $0x20] sm:$0xff]  ;;  %v553_v55 = vld [vmem:[%s5171_s3 + $0x30] sm:$0xff] }
  0xb2   : > { %v4509_v12 = vpop.eup %3575  ;;  %3595 = vtanh.f32 %v513_v56  ;;  %3280 = vmatprep.subr.bf16.mxu0 %v3279_v4  ;;  %v3295_v13 = vpack.c.bf16 %v4488_v48, %v4503_v6  ;;  %v554_v56 = vld [vmem:[%s5171_s3 + $0x38] sm:$0xff]  ;;  %v566_v59 = vpop.permute.xlu0 %565 }
  0xb3   : > { %v4513_v16 = vpop.eup %3577  ;;  %3597 = vtanh.f32 %v514_v63  ;;  %3282 = vmatpush1.bf16.msra.mxu0 %v3281_v14 }
  0xb4   : > { %v4515_v19 = vpop.eup %3579  ;;  %3599 = vtanh.f32 %v507_v2  ;;  %3296 = vmatprep.subr.bf16.mxu1 %v3295_v13 }
  0xb5   : > { %v4517_v20 = vpop.eup %3581  ;;  %3601 = vtanh.f32 %v508_v8  ;;  %3298 = vmatpush1.bf16.msra.mxu1 %v3297_v11  ;;  %v571_v11 = vpop.permute.xlu1 %570 }
  0xb6   : > { %v4519_v21 = vpop.eup %3583  ;;  %3603 = vtanh.f32 %v509_v15 }
  0xb7   : > { %v4521_v22 = vpop.eup %3585  ;;  %3605 = vtanh.f32 %v510_v18  ;;  %v3285_v24 = vpack.c.bf16 %v4509_v12, %v4519_v21 }
  0xb8   : > { %v4525_v25 = vpop.eup %3587  ;;  %v3283_v26 = vpack.c.bf16 %v4513_v16, %v4521_v22 }
  0xb9   : > { %v4529_v28 = vpop.eup %3589  ;;  %v3301_v29 = vpack.c.bf16 %v4515_v19, %v4525_v25 }
  0xba   : > { %v4533_v30 = vpop.eup %3591  ;;  %3284 = vmatprep.subr.bf16.mxu0 %v3283_v26  ;;  %v3299_v31 = vpack.c.bf16 %v4517_v20, %v4529_v28 }
  0xbb   : > { %v4537_v33 = vpop.eup %3593  ;;  %3286 = vmatpush1.bf16.msra.mxu0 %v3285_v24 }
  0xbc   : > { %v4539_v34 = vpop.eup %3595  ;;  %3300 = vmatprep.subr.bf16.mxu1 %v3299_v31 }
  0xbd   : > { %v4541_v35 = vpop.eup %3597  ;;  %3302 = vmatpush1.bf16.msra.mxu1 %v3301_v29 }
  0xbe   : > { %v4543_v36 = vpop.eup %3599 }
  0xbf   : > { %v4545_v37 = vpop.eup %3601  ;;  %v3289_v38 = vpack.c.bf16 %v4533_v30, %v4543_v36 }
  0xc0   : > { %v4549_v39 = vpop.eup %3603  ;;  %v3287_v41 = vpack.c.bf16 %v4537_v33, %v4545_v37 }
  0xc1   : > { %v4553_v43 = vpop.eup %3605  ;;  %v3305_v45 = vpack.c.bf16 %v4539_v34, %v4549_v39 }
  0xc2   : > { %3288 = vmatprep.subr.bf16.mxu0 %v3287_v41  ;;  %v3303_v46 = vpack.c.bf16 %v4541_v35, %v4553_v43  ;;  %v576_v41 = vpop.permute.xlu0 %575 }
  0xc3   : > { %3290 = vmatpush1.bf16.msra.mxu0 %v3289_v38 }
  0xc4   : > { %3304 = vmatprep.subr.bf16.mxu1 %v3303_v46 }
  0xc5   : > { %3306 = vmatpush1.bf16.msra.mxu1 %v3305_v45 }
  0xc6   : > { %3085 = vmatmul.mubr.msk.f32.vlgmr.msra.gmra.mrb[0].mxu0 %vm603_vm0, %v547_v47 }
  0xc7   : > { %698 = vmatprep.mubr.f32.mxu0 %v4088_v32 }
  0xc8   : > { %3093 = vmatmul.mubr.msk.f32.vlgmr.msra.gmra.mrb[0].mxu1 %vm603_vm0, %v547_v47 }
  0xc9   : > { %811 = vmatprep.mubr.f32.mxu1 %v4088_v32 }
  0xca   : > { %3086 = vmatmul.mubr.msk.f32.gmra.mrb[2].mxu0 %vm603_vm0, %v548_v49 }
  0xcb   : > { %704 = vmatprep.mubr.f32.mxu0 %v4088_v32 }
  0xcc   : > { %3094 = vmatmul.mubr.msk.f32.gmra.mrb[2].mxu1 %vm603_vm0, %v548_v49 }
  0xcd   : > { %817 = vmatprep.mubr.f32.mxu1 %v4088_v32 }
  0xce   : > { %3087 = vmatmul.mubr.msk.f32.gmra.mrb[4].mxu0 %vm603_vm0, %v549_v50 }
  0xcf   : > { %710 = vmatprep.mubr.f32.mxu0 %v4088_v32 }
  0xd0   : > { %3095 = vmatmul.mubr.msk.f32.gmra.mrb[4].mxu1 %vm603_vm0, %v549_v50 }
  0xd1   : > { %823 = vmatprep.mubr.f32.mxu1 %v4088_v32 }
  0xd2   : > { %3088 = vmatmul.mubr.msk.f32.gmra.mrb[6].mxu0 %vm603_vm0, %v550_v51 }
  0xd3   : > { %716 = vmatprep.mubr.f32.mxu0 %v4088_v32 }
  0xd4   : > { %3096 = vmatmul.mubr.msk.f32.gmra.mrb[6].mxu1 %vm603_vm0, %v550_v51 }
  0xd5   : > { %829 = vmatprep.mubr.f32.mxu1 %v4088_v32 }
  0xd6   : > { %3089 = vmatmul.mubr.msk.f32.gmra.mrb[8].mxu0 %vm603_vm0, %v551_v52 }
  0xd7   : > { %722 = vmatprep.mubr.f32.mxu0 %v4088_v32 }
  0xd8   : > { %3097 = vmatmul.mubr.msk.f32.gmra.mrb[8].mxu1 %vm603_vm0, %v551_v52 }
  0xd9   : > { %835 = vmatprep.mubr.f32.mxu1 %v4088_v32 }
  0xda   : > { %3090 = vmatmul.mubr.msk.f32.gmra.mrb[10].mxu0 %vm603_vm0, %v552_v54 }
  0xdb   : > { %728 = vmatprep.mubr.f32.mxu0 %v4088_v32 }
  0xdc   : > { %3098 = vmatmul.mubr.msk.f32.gmra.mrb[10].mxu1 %vm603_vm0, %v552_v54 }
  0xdd   : > { %841 = vmatprep.mubr.f32.mxu1 %v4088_v32 }
  0xde   : > { %3091 = vmatmul.mubr.msk.f32.gmra.mrb[12].mxu0 %vm603_vm0, %v553_v55 }
  0xdf   : > { %734 = vmatprep.mubr.f32.mxu0 %v4088_v32 }
  0xe0   : > { %3099 = vmatmul.mubr.msk.f32.gmra.mrb[12].mxu1 %vm603_vm0, %v553_v55  ;;  %v581_v55 = vpop.permute.xlu1 %580 }
  0xe1   : > { %847 = vmatprep.mubr.f32.mxu1 %v4088_v32 }
  0xe2   : > { %3092 = vmatmul.mubr.msk.f32.gmra.mrb[14].mxu0 %vm603_vm0, %v554_v56 }
  0xe3   : > { %1032 = vmatprep.mubr.f32.mxu0 %v4088_v32 }
  0xe4   : > { %3100 = vmatmul.mubr.msk.f32.gmra.mrb[14].mxu1 %vm603_vm0, %v554_v56 }
  0xe5   : > { %1145 = vmatprep.mubr.f32.mxu1 %v4088_v32 }
 0x199   : > { %v694_v60 = vpop.f32.mrb[0].mxu0 }
 0x19a   : > { %v695_v63 = vadd.f32 %v694_v60, %v566_v59  ;;  %v696_v10 = vpop.f32.mrb[1].mxu0 }
 0x19b   : > { %v807_v2 = vpop.f32.mrb[0].mxu1  ;;  %v697_v4 = vadd.f32 %v696_v10, %v566_v59 }
 0x19c   : > { %3607 = vtanh.f32 %v695_v63  ;;  %v808_v8 = vadd.f32 %v807_v2, %v566_v59  ;;  %v809_v14 = vpop.f32.mrb[1].mxu1 }
 0x19d   : > { %3609 = vtanh.f32 %v697_v4  ;;  %v810_v15 = vadd.f32 %v809_v14, %v566_v59  ;;  %v700_v13 = vpop.f32.mrb[2].mxu0 }
 0x19e   : > { %3611 = vtanh.f32 %v808_v8  ;;  %v701_v18 = vadd.f32 %v700_v13, %v571_v11  ;;  %v702_v24 = vpop.f32.mrb[3].mxu0 }
 0x19f   : > { %3613 = vtanh.f32 %v810_v15  ;;  %v813_v26 = vpop.f32.mrb[2].mxu1  ;;  %v703_v29 = vadd.f32 %v702_v24, %v571_v11 }
 0x1a0   : > { %3615 = vtanh.f32 %v701_v18  ;;  %v814_v31 = vadd.f32 %v813_v26, %v571_v11  ;;  %v815_v38 = vpop.f32.mrb[3].mxu1  ;;  %v586_v18 = vpop.permute.xlu0 %585 }
 0x1a1   : > { %3617 = vtanh.f32 %v703_v29  ;;  %v816_v45 = vadd.f32 %v815_v38, %v571_v11  ;;  %v706_v46 = vpop.f32.mrb[4].mxu0 }
 0x1a2   : > { %3619 = vtanh.f32 %v814_v31  ;;  %v707_v47 = vadd.f32 %v706_v46, %v576_v41  ;;  %v708_v49 = vpop.f32.mrb[5].mxu0 }
 0x1a3   : > { %3621 = vtanh.f32 %v816_v45  ;;  %v819_v50 = vpop.f32.mrb[4].mxu1  ;;  %v709_v51 = vadd.f32 %v708_v49, %v576_v41 }
 0x1a4   : > { %3623 = vtanh.f32 %v707_v47  ;;  %v820_v52 = vadd.f32 %v819_v50, %v576_v41  ;;  %v821_v54 = vpop.f32.mrb[5].mxu1 }
 0x1a5   : > { %3625 = vtanh.f32 %v709_v51  ;;  %v822_v56 = vadd.f32 %v821_v54, %v576_v41  ;;  %v712_v59 = vpop.f32.mrb[6].mxu0 }
 0x1a6   : > { %v3608_v60 = vpop.eup %3607  ;;  %3627 = vtanh.f32 %v820_v52  ;;  %v713_v63 = vadd.f32 %v712_v59, %v581_v55  ;;  %v714_v10 = vpop.f32.mrb[7].mxu0 }
 0x1a7   : > { %v3610_v2 = vpop.eup %3609  ;;  %3629 = vtanh.f32 %v822_v56  ;;  %v825_v4 = vpop.f32.mrb[6].mxu1  ;;  %v715_v8 = vadd.f32 %v714_v10, %v581_v55 }
 0x1a8   : > { %v3612_v14 = vpop.eup %3611  ;;  %3631 = vtanh.f32 %v713_v63  ;;  %v826_v11 = vadd.f32 %v825_v4, %v581_v55  ;;  %v827_v15 = vpop.f32.mrb[7].mxu1 }
 0x1a9   : > { %v3614_v13 = vpop.eup %3613  ;;  %3633 = vtanh.f32 %v715_v8  ;;  %v828_v24 = vadd.f32 %v827_v15, %v581_v55  ;;  %v718_v26 = vpop.f32.mrb[8].mxu0 }
 0x1aa   : > { %v3616_v29 = vpop.eup %3615  ;;  %3635 = vtanh.f32 %v826_v11  ;;  %v719_v31 = vadd.f32 %v718_v26, %v586_v18  ;;  %v720_v38 = vpop.f32.mrb[9].mxu0 }
 0x1ab   : > { %v3618_v41 = vpop.eup %3617  ;;  %3637 = vtanh.f32 %v828_v24  ;;  %v831_v45 = vpop.f32.mrb[8].mxu1  ;;  %v721_v46 = vadd.f32 %v720_v38, %v586_v18  ;;  %v3309_v47 = vpack.c.bf16 %v3616_v29, %v3608_v60 }
 0x1ac   : > { %v3620_v49 = vpop.eup %3619  ;;  %3639 = vtanh.f32 %v719_v31  ;;  %v832_v50 = vadd.f32 %v831_v45, %v586_v18  ;;  %v833_v51 = vpop.f32.mrb[9].mxu1  ;;  %v3307_v52 = vpack.c.bf16 %v3618_v41, %v3610_v2 }
 0x1ad   : > { %v3622_v54 = vpop.eup %3621  ;;  %v591_v56 = vpop.permute.xlu1 %590  ;;  %3641 = vtanh.f32 %v721_v46  ;;  %v834_v59 = vadd.f32 %v833_v51, %v586_v18  ;;  %v3325_v63 = vpack.c.bf16 %v3620_v49, %v3612_v14 }
 0x1ae   : > { %v724_v55 = vpop.f32.mrb[10].mxu0  ;;  %v3624_v10 = vpop.eup %3623  ;;  %3643 = vtanh.f32 %v832_v50  ;;  %3308 = vmatprep.subr.bf16.mxu0 %v3307_v52  ;;  %v3323_v11 = vpack.c.bf16 %v3622_v54, %v3614_v13 }
 0x1af   : > { %v725_v4 = vadd.f32 %v724_v55, %v591_v56  ;;  %v726_v8 = vpop.f32.mrb[11].mxu0  ;;  %v3626_v15 = vpop.eup %3625  ;;  %3645 = vtanh.f32 %v834_v59  ;;  %3310 = vmatpush1.bf16.msra.mxu0 %v3309_v47 }
 0x1b0   : > { %v837_v60 = vpop.f32.mrb[10].mxu1  ;;  %v727_v24 = vadd.f32 %v726_v8, %v591_v56  ;;  %v3628_v26 = vpop.eup %3627  ;;  %3324 = vmatprep.subr.bf16.mxu1 %v3323_v11 }
 0x1b1   : > { %3647 = vtanh.f32 %v725_v4  ;;  %v838_v2 = vadd.f32 %v837_v60, %v591_v56  ;;  %v839_v29 = vpop.f32.mrb[11].mxu1  ;;  %v3630_v31 = vpop.eup %3629  ;;  %3326 = vmatpush1.bf16.msra.mxu1 %v3325_v63 }
 0x1b2   : > { %v596_v18 = vpop.permute.xlu0 %595  ;;  %3649 = vtanh.f32 %v727_v24  ;;  %v840_v14 = vadd.f32 %v839_v29, %v591_v56  ;;  %v730_v38 = vpop.f32.mrb[12].mxu0 }
 0x1b3   : > { %v3632_v41 = vpop.eup %3631  ;;  %3651 = vtanh.f32 %v838_v2  ;;  %v731_v45 = vadd.f32 %v730_v38, %v596_v18  ;;  %v732_v13 = vpop.f32.mrb[13].mxu0 }
 0x1b4   : > { %v3634_v46 = vpop.eup %3633  ;;  %3653 = vtanh.f32 %v840_v14  ;;  %v843_v49 = vpop.f32.mrb[12].mxu1  ;;  %v733_v50 = vadd.f32 %v732_v13, %v596_v18  ;;  %v3313_v47 = vpack.c.bf16 %v3632_v41, %v3624_v10 }
 0x1b5   : > { %v3636_v51 = vpop.eup %3635  ;;  %3655 = vtanh.f32 %v731_v45  ;;  %v844_v52 = vadd.f32 %v843_v49, %v596_v18  ;;  %v845_v54 = vpop.f32.mrb[13].mxu1  ;;  %v3311_v59 = vpack.c.bf16 %v3634_v46, %v3626_v15 }
 0x1b6   : > { %v3638_v55 = vpop.eup %3637  ;;  %v601_v4 = vpop.permute.xlu1 %600  ;;  %3657 = vtanh.f32 %v733_v50  ;;  %v846_v56 = vadd.f32 %v845_v54, %v596_v18  ;;  %v3329_v8 = vpack.c.bf16 %v3636_v51, %v3628_v26 }
 0x1b7   : > { %v736_v63 = vpop.f32.mrb[14].mxu0  ;;  %v3640_v11 = vpop.eup %3639  ;;  %3659 = vtanh.f32 %v844_v52  ;;  %3312 = vmatprep.subr.bf16.mxu0 %v3311_v59  ;;  %v3327_v2 = vpack.c.bf16 %v3638_v55, %v3630_v31 }
 0x1b8   : > { %v737_v60 = vadd.f32 %v736_v63, %v601_v4  ;;  %v738_v24 = vpop.f32.mrb[15].mxu0  ;;  %v3642_v29 = vpop.eup %3641  ;;  %3661 = vtanh.f32 %v846_v56  ;;  %3314 = vmatpush1.bf16.msra.mxu0 %v3313_v47 }
 0x1b9   : > { %v849_v10 = vpop.f32.mrb[14].mxu1  ;;  %v739_v14 = vadd.f32 %v738_v24, %v601_v4  ;;  %v3644_v38 = vpop.eup %3643  ;;  %3328 = vmatprep.subr.bf16.mxu1 %v3327_v2 }
 0x1ba   : > { %3663 = vtanh.f32 %v737_v60  ;;  %v850_v15 = vadd.f32 %v849_v10, %v601_v4  ;;  %v851_v41 = vpop.f32.mrb[15].mxu1  ;;  %v3646_v45 = vpop.eup %3645  ;;  %3330 = vmatpush1.bf16.msra.mxu1 %v3329_v8  ;;  %v3102_v10 = vld [vmem:[%s5171_s3 + $0x48] sm:$0xff] }
 0x1bb   : > { %3665 = vtanh.f32 %v739_v14  ;;  %v852_v18 = vadd.f32 %v851_v41, %v601_v4  ;;  %v3648_v26 = vpop.eup %3647  ;;  %v3103_v14 = vld [vmem:[%s5171_s3 + $0x50] sm:$0xff]  ;;  %v3106_v41 = vld [vmem:[%s5171_s3 + $0x68] sm:$0xff] }
 0x1bc   : > { %3667 = vtanh.f32 %v850_v15  ;;  %v3650_v13 = vpop.eup %3649  ;;  %v3317_v46 = vpack.c.bf16 %v3648_v26, %v3640_v11  ;;  %v3105_v15 = vld [vmem:[%s5171_s3 + $0x60] sm:$0xff]  ;;  %v907_v26 = vpop.permute.xlu0 %906 }
 0x1bd   : > { %3669 = vtanh.f32 %v852_v18  ;;  %v3652_v31 = vpop.eup %3651  ;;  %v3315_v49 = vpack.c.bf16 %v3650_v13, %v3642_v29  ;;  %v3101_v29 = vld [vmem:[%s5171_s3 + $0x40] sm:$0xff]  ;;  %v3108_v18 = vld [vmem:[%s5171_s3 + $0x78] sm:$0xff] }
 0x1be   : > { %v3654_v50 = vpop.eup %3653  ;;  %v3333_v51 = vpack.c.bf16 %v3652_v31, %v3644_v38  ;;  %v3104_v38 = vld [vmem:[%s5171_s3 + $0x58] sm:$0xff] }
 0x1bf   : > { %v3656_v52 = vpop.eup %3655  ;;  %3316 = vmatprep.subr.bf16.mxu0 %v3315_v49  ;;  %v3331_v47 = vpack.c.bf16 %v3654_v50, %v3646_v45  ;;  %v3107_v45 = vld [vmem:[%s5171_s3 + $0x70] sm:$0xff] }
 0x1c0   : > { %v3658_v54 = vpop.eup %3657  ;;  %3318 = vmatpush1.bf16.msra.mxu0 %v3317_v46 }
 0x1c1   : > { %v3660_v59 = vpop.eup %3659  ;;  %3332 = vmatprep.subr.bf16.mxu1 %v3331_v47  ;;  %v912_v47 = vpop.permute.xlu1 %911 }
 0x1c2   : > { %v3662_v55 = vpop.eup %3661  ;;  %3334 = vmatpush1.bf16.msra.mxu1 %v3333_v51 }
 0x1c4   : > { %v3664_v4 = vpop.eup %3663 }
 0x1c5   : > { %v3666_v56 = vpop.eup %3665  ;;  %v3321_v63 = vpack.c.bf16 %v3664_v4, %v3656_v52 }
 0x1c6   : > { %v3668_v8 = vpop.eup %3667  ;;  %v3319_v60 = vpack.c.bf16 %v3666_v56, %v3658_v54 }
 0x1c7   : > { %v3670_v24 = vpop.eup %3669  ;;  %v3337_v11 = vpack.c.bf16 %v3668_v8, %v3660_v59 }
 0x1c8   : > { %3320 = vmatprep.subr.bf16.mxu0 %v3319_v60  ;;  %v3335_v2 = vpack.c.bf16 %v3670_v24, %v3662_v55  ;;  %v917_v24 = vpop.permute.xlu0 %916 }
 0x1c9   : > { %3322 = vmatpush1.bf16.msra.mxu0 %v3321_v63 }
 0x1ca   : > { %3336 = vmatprep.subr.bf16.mxu1 %v3335_v2 }
 0x1cb   : > { %3338 = vmatpush1.bf16.msra.mxu1 %v3337_v11 }
 0x1cc   : > { %3117 = vmatmul.mubr.msk.f32.vlgmr.msra.gmra.mrb[16].mxu0 %vm603_vm0, %v3101_v29 }
 0x1cd   : > { %1038 = vmatprep.mubr.f32.mxu0 %v4088_v32 }
 0x1ce   : > { %3125 = vmatmul.mubr.msk.f32.vlgmr.msra.gmra.mrb[16].mxu1 %vm603_vm0, %v3101_v29 }
 0x1cf   : > { %1151 = vmatprep.mubr.f32.mxu1 %v4088_v32 }
 0x1d0   : > { %3118 = vmatmul.mubr.msk.f32.gmra.mrb[18].mxu0 %vm603_vm0, %v3102_v10 }
 0x1d1   : > { %1044 = vmatprep.mubr.f32.mxu0 %v4088_v32 }
 0x1d2   : > { %3126 = vmatmul.mubr.msk.f32.gmra.mrb[18].mxu1 %vm603_vm0, %v3102_v10 }
 0x1d3   : > { %1157 = vmatprep.mubr.f32.mxu1 %v4088_v32 }
 0x1d4   : > { %3119 = vmatmul.mubr.msk.f32.gmra.mrb[20].mxu0 %vm603_vm0, %v3103_v14 }
 0x1d5   : > { %1050 = vmatprep.mubr.f32.mxu0 %v4088_v32 }
 0x1d6   : > { %3127 = vmatmul.mubr.msk.f32.gmra.mrb[20].mxu1 %vm603_vm0, %v3103_v14 }
 0x1d7   : > { %1163 = vmatprep.mubr.f32.mxu1 %v4088_v32 }
 0x1d8   : > { %3120 = vmatmul.mubr.msk.f32.gmra.mrb[22].mxu0 %vm603_vm0, %v3104_v38 }
 0x1d9   : > { %1056 = vmatprep.mubr.f32.mxu0 %v4088_v32 }
 0x1da   : > { %3128 = vmatmul.mubr.msk.f32.gmra.mrb[22].mxu1 %vm603_vm0, %v3104_v38 }
 0x1db   : > { %1169 = vmatprep.mubr.f32.mxu1 %v4088_v32 }
 0x1dc   : > { %3121 = vmatmul.mubr.msk.f32.gmra.mrb[24].mxu0 %vm603_vm0, %v3105_v15 }
 0x1dd   : > { %1062 = vmatprep.mubr.f32.mxu0 %v4088_v32 }
 0x1de   : > { %3129 = vmatmul.mubr.msk.f32.gmra.mrb[24].mxu1 %vm603_vm0, %v3105_v15 }
 0x1df   : > { %1175 = vmatprep.mubr.f32.mxu1 %v4088_v32 }
 0x1e0   : > { %3122 = vmatmul.mubr.msk.f32.gmra.mrb[26].mxu0 %vm603_vm0, %v3106_v41 }
 0x1e1   : > { %1068 = vmatprep.mubr.f32.mxu0 %v4088_v32 }
 0x1e2   : > { %3130 = vmatmul.mubr.msk.f32.gmra.mrb[26].mxu1 %vm603_vm0, %v3106_v41 }
 0x1e3   : > { %1181 = vmatprep.mubr.f32.mxu1 %v4088_v32 }
 0x1e4   : > { %3123 = vmatmul.mubr.msk.f32.gmra.mrb[28].mxu0 %vm603_vm0, %v3107_v45 }
 0x1e5   : > { %1074 = vmatprep.mubr.f32.mxu0 %v4088_v32 }
 0x1e6   : > { %3131 = vmatmul.mubr.msk.f32.gmra.mrb[28].mxu1 %vm603_vm0, %v3107_v45  ;;  %v922_v45 = vpop.permute.xlu1 %921 }
 0x1e7   : > { %1187 = vmatprep.mubr.f32.mxu1 %v4088_v32 }
 0x1e8   : > { %3124 = vmatmul.mubr.msk.f32.gmra.mrb[30].mxu0 %vm603_vm0, %v3108_v18 }
 0x1e9   : > { %1372 = vmatprep.mubr.f32.mxu0 %v4088_v32 }
 0x1ea   : > { %3132 = vmatmul.mubr.msk.f32.gmra.mrb[30].mxu1 %vm603_vm0, %v3108_v18 }
 0x1eb   : > { %1485 = vmatprep.mubr.f32.mxu1 %v4088_v32 }
 0x29f   : > { %v1034_v13 = vpop.f32.mrb[16].mxu0 }
 0x2a0   : > { %v1035_v46 = vadd.f32 %v1034_v13, %v907_v26  ;;  %v1036_v31 = vpop.f32.mrb[17].mxu0 }
 0x2a1   : > { %v1147_v49 = vpop.f32.mrb[16].mxu1  ;;  %v1037_v50 = vadd.f32 %v1036_v31, %v907_v26 }
 0x2a2   : > { %3671 = vtanh.f32 %v1035_v46  ;;  %v1148_v51 = vadd.f32 %v1147_v49, %v907_v26  ;;  %v1149_v52 = vpop.f32.mrb[17].mxu1 }
 0x2a3   : > { %3673 = vtanh.f32 %v1037_v50  ;;  %v1150_v54 = vadd.f32 %v1149_v52, %v907_v26  ;;  %v1040_v59 = vpop.f32.mrb[18].mxu0 }
 0x2a4   : > { %3675 = vtanh.f32 %v1148_v51  ;;  %v1041_v55 = vadd.f32 %v1040_v59, %v912_v47  ;;  %v1042_v4 = vpop.f32.mrb[19].mxu0 }
 0x2a5   : > { %3677 = vtanh.f32 %v1150_v54  ;;  %v1153_v56 = vpop.f32.mrb[18].mxu1  ;;  %v1043_v63 = vadd.f32 %v1042_v4, %v912_v47 }
 0x2a6   : > { %3679 = vtanh.f32 %v1041_v55  ;;  %v1154_v8 = vadd.f32 %v1153_v56, %v912_v47  ;;  %v1155_v60 = vpop.f32.mrb[19].mxu1  ;;  %v927_v55 = vpop.permute.xlu0 %926 }
 0x2a7   : > { %3681 = vtanh.f32 %v1043_v63  ;;  %v1156_v11 = vadd.f32 %v1155_v60, %v912_v47  ;;  %v1046_v2 = vpop.f32.mrb[20].mxu0 }
 0x2a8   : > { %3683 = vtanh.f32 %v1154_v8  ;;  %v1047_v29 = vadd.f32 %v1046_v2, %v917_v24  ;;  %v1048_v10 = vpop.f32.mrb[21].mxu0 }
 0x2a9   : > { %3685 = vtanh.f32 %v1156_v11  ;;  %v1159_v14 = vpop.f32.mrb[20].mxu1  ;;  %v1049_v38 = vadd.f32 %v1048_v10, %v917_v24 }
 0x2aa   : > { %3687 = vtanh.f32 %v1047_v29  ;;  %v1160_v15 = vadd.f32 %v1159_v14, %v917_v24  ;;  %v1161_v41 = vpop.f32.mrb[21].mxu1 }
 0x2ab   : > { %3689 = vtanh.f32 %v1049_v38  ;;  %v1162_v18 = vadd.f32 %v1161_v41, %v917_v24  ;;  %v1052_v26 = vpop.f32.mrb[22].mxu0 }
 0x2ac   : > { %v3672_v13 = vpop.eup %3671  ;;  %3691 = vtanh.f32 %v1160_v15  ;;  %v1053_v46 = vadd.f32 %v1052_v26, %v922_v45  ;;  %v1054_v31 = vpop.f32.mrb[23].mxu0 }
 0x2ad   : > { %v3674_v49 = vpop.eup %3673  ;;  %3693 = vtanh.f32 %v1162_v18  ;;  %v1165_v50 = vpop.f32.mrb[22].mxu1  ;;  %v1055_v51 = vadd.f32 %v1054_v31, %v922_v45 }
 0x2ae   : > { %v3676_v52 = vpop.eup %3675  ;;  %3695 = vtanh.f32 %v1053_v46  ;;  %v1166_v47 = vadd.f32 %v1165_v50, %v922_v45  ;;  %v1167_v54 = vpop.f32.mrb[23].mxu1 }
 0x2af   : > { %v3678_v59 = vpop.eup %3677  ;;  %3697 = vtanh.f32 %v1055_v51  ;;  %v1168_v4 = vadd.f32 %v1167_v54, %v922_v45  ;;  %v1058_v56 = vpop.f32.mrb[24].mxu0 }
 0x2b0   : > { %v3680_v63 = vpop.eup %3679  ;;  %3699 = vtanh.f32 %v1166_v47  ;;  %v1059_v8 = vadd.f32 %v1058_v56, %v927_v55  ;;  %v1060_v60 = vpop.f32.mrb[25].mxu0 }
 0x2b1   : > { %v3682_v24 = vpop.eup %3681  ;;  %3701 = vtanh.f32 %v1168_v4  ;;  %v1171_v11 = vpop.f32.mrb[24].mxu1  ;;  %v1061_v2 = vadd.f32 %v1060_v60, %v927_v55  ;;  %v3341_v29 = vpack.c.bf16 %v3680_v63, %v3672_v13 }
 0x2b2   : > { %v3684_v10 = vpop.eup %3683  ;;  %3703 = vtanh.f32 %v1059_v8  ;;  %v1172_v14 = vadd.f32 %v1171_v11, %v927_v55  ;;  %v1173_v38 = vpop.f32.mrb[25].mxu1  ;;  %v3339_v15 = vpack.c.bf16 %v3682_v24, %v3674_v49 }
 0x2b3   : > { %v3686_v41 = vpop.eup %3685  ;;  %v932_v18 = vpop.permute.xlu1 %931  ;;  %3705 = vtanh.f32 %v1061_v2  ;;  %v1174_v26 = vadd.f32 %v1173_v38, %v927_v55  ;;  %v3357_v46 = vpack.c.bf16 %v3684_v10, %v3676_v52 }
 0x2b4   : > { %v1064_v45 = vpop.f32.mrb[26].mxu0  ;;  %v3688_v31 = vpop.eup %3687  ;;  %3707 = vtanh.f32 %v1172_v14  ;;  %3340 = vmatprep.subr.bf16.mxu0 %v3339_v15  ;;  %v3355_v47 = vpack.c.bf16 %v3686_v41, %v3678_v59 }
 0x2b5   : > { %v1065_v50 = vadd.f32 %v1064_v45, %v932_v18  ;;  %v1066_v51 = vpop.f32.mrb[27].mxu0  ;;  %v3690_v54 = vpop.eup %3689  ;;  %3709 = vtanh.f32 %v1174_v26  ;;  %3342 = vmatpush1.bf16.msra.mxu0 %v3341_v29 }
 0x2b6   : > { %v1177_v13 = vpop.f32.mrb[26].mxu1  ;;  %v1067_v4 = vadd.f32 %v1066_v51, %v932_v18  ;;  %v3692_v56 = vpop.eup %3691  ;;  %3356 = vmatprep.subr.bf16.mxu1 %v3355_v47 }
 0x2b7   : > { %3711 = vtanh.f32 %v1065_v50  ;;  %v1178_v49 = vadd.f32 %v1177_v13, %v932_v18  ;;  %v1179_v63 = vpop.f32.mrb[27].mxu1  ;;  %v3694_v8 = vpop.eup %3693  ;;  %3358 = vmatpush1.bf16.msra.mxu1 %v3357_v46 }
 0x2b8   : > { %v937_v55 = vpop.permute.xlu0 %936  ;;  %3713 = vtanh.f32 %v1067_v4  ;;  %v1180_v52 = vadd.f32 %v1179_v63, %v932_v18  ;;  %v1070_v60 = vpop.f32.mrb[28].mxu0 }
 0x2b9   : > { %v3696_v24 = vpop.eup %3695  ;;  %3715 = vtanh.f32 %v1178_v49  ;;  %v1071_v11 = vadd.f32 %v1070_v60, %v937_v55  ;;  %v1072_v59 = vpop.f32.mrb[29].mxu0 }
 0x2ba   : > { %v3698_v2 = vpop.eup %3697  ;;  %3717 = vtanh.f32 %v1180_v52  ;;  %v1183_v10 = vpop.f32.mrb[28].mxu1  ;;  %v1073_v14 = vadd.f32 %v1072_v59, %v937_v55  ;;  %v3345_v29 = vpack.c.bf16 %v3696_v24, %v3688_v31 }
 0x2bb   : > { %v3700_v38 = vpop.eup %3699  ;;  %3719 = vtanh.f32 %v1071_v11  ;;  %v1184_v15 = vadd.f32 %v1183_v10, %v937_v55  ;;  %v1185_v41 = vpop.f32.mrb[29].mxu1  ;;  %v3343_v26 = vpack.c.bf16 %v3698_v2, %v3690_v54 }
 0x2bc   : > { %v3702_v45 = vpop.eup %3701  ;;  %v942_v50 = vpop.permute.xlu1 %941  ;;  %3721 = vtanh.f32 %v1073_v14  ;;  %v1186_v18 = vadd.f32 %v1185_v41, %v937_v55  ;;  %v3361_v51 = vpack.c.bf16 %v3700_v38, %v3692_v56 }
 0x2bd   : > { %v1076_v46 = vpop.f32.mrb[30].mxu0  ;;  %v3704_v47 = vpop.eup %3703  ;;  %3723 = vtanh.f32 %v1184_v15  ;;  %3344 = vmatprep.subr.bf16.mxu0 %v3343_v26  ;;  %v3359_v49 = vpack.c.bf16 %v3702_v45, %v3694_v8 }
 0x2be   : > { %v1077_v13 = vadd.f32 %v1076_v46, %v942_v50  ;;  %v1078_v4 = vpop.f32.mrb[31].mxu0  ;;  %v3706_v63 = vpop.eup %3705  ;;  %3725 = vtanh.f32 %v1186_v18  ;;  %3346 = vmatpush1.bf16.msra.mxu0 %v3345_v29 }
 0x2bf   : > { %v1189_v31 = vpop.f32.mrb[30].mxu1  ;;  %v1079_v52 = vadd.f32 %v1078_v4, %v942_v50  ;;  %v3708_v60 = vpop.eup %3707  ;;  %3360 = vmatprep.subr.bf16.mxu1 %v3359_v49 }
 0x2c0   : > { %3727 = vtanh.f32 %v1077_v13  ;;  %v1190_v54 = vadd.f32 %v1189_v31, %v942_v50  ;;  %v1191_v24 = vpop.f32.mrb[31].mxu1  ;;  %v3710_v11 = vpop.eup %3709  ;;  %3362 = vmatpush1.bf16.msra.mxu1 %v3361_v51  ;;  %v3134_v31 = vld [vmem:[%s5171_s3 + $0x88] sm:$0xff] }
 0x2c1   : > { %3729 = vtanh.f32 %v1079_v52  ;;  %v1192_v55 = vadd.f32 %v1191_v24, %v942_v50  ;;  %v3712_v56 = vpop.eup %3711  ;;  %v3135_v52 = vld [vmem:[%s5171_s3 + $0x90] sm:$0xff]  ;;  %v3138_v24 = vld [vmem:[%s5171_s3 + $0xa8] sm:$0xff] }
 0x2c2   : > { %3731 = vtanh.f32 %v1190_v54  ;;  %v3714_v59 = vpop.eup %3713  ;;  %v3349_v2 = vpack.c.bf16 %v3712_v56, %v3704_v47  ;;  %v3137_v54 = vld [vmem:[%s5171_s3 + $0xa0] sm:$0xff] }
 0x2c3   : > { %3733 = vtanh.f32 %v1192_v55  ;;  %v3716_v8 = vpop.eup %3715  ;;  %v3347_v10 = vpack.c.bf16 %v3714_v59, %v3706_v63  ;;  %v3133_v63 = vld [vmem:[%s5171_s3 + $0x80] sm:$0xff]  ;;  %v3140_v55 = vld [vmem:[%s5171_s3 + $0xb8] sm:$0xff] }
 0x2c4   : > { %v3718_v14 = vpop.eup %3717  ;;  %v3365_v38 = vpack.c.bf16 %v3716_v8, %v3708_v60  ;;  %v3136_v60 = vld [vmem:[%s5171_s3 + $0x98] sm:$0xff]  ;;  %v1247_v8 = vpop.permute.xlu0 %1246 }
 0x2c5   : > { %v3720_v15 = vpop.eup %3719  ;;  %3348 = vmatprep.subr.bf16.mxu0 %v3347_v10  ;;  %v3363_v29 = vpack.c.bf16 %v3718_v14, %v3710_v11  ;;  %v3139_v11 = vld [vmem:[%s5171_s3 + $0xb0] sm:$0xff]  ;;  %v1252_v14 = vpop.permute.xlu1 %1251 }
 0x2c6   : > { %v3722_v41 = vpop.eup %3721  ;;  %3350 = vmatpush1.bf16.msra.mxu0 %v3349_v2 }
 0x2c7   : > { %v3724_v26 = vpop.eup %3723  ;;  %3364 = vmatprep.subr.bf16.mxu1 %v3363_v29 }
 0x2c8   : > { %v3726_v45 = vpop.eup %3725  ;;  %3366 = vmatpush1.bf16.msra.mxu1 %v3365_v38 }
 0x2ca   : > { %v3728_v50 = vpop.eup %3727 }
 0x2cb   : > { %v3730_v18 = vpop.eup %3729  ;;  %v3353_v46 = vpack.c.bf16 %v3728_v50, %v3720_v15 }
 0x2cc   : > { %v3732_v51 = vpop.eup %3731  ;;  %v3351_v13 = vpack.c.bf16 %v3730_v18, %v3722_v41 }
 0x2cd   : > { %v3734_v4 = vpop.eup %3733  ;;  %v3369_v47 = vpack.c.bf16 %v3732_v51, %v3724_v26 }
 0x2ce   : > { %3352 = vmatprep.subr.bf16.mxu0 %v3351_v13  ;;  %v3367_v49 = vpack.c.bf16 %v3734_v4, %v3726_v45 }
 0x2cf   : > { %3354 = vmatpush1.bf16.msra.mxu0 %v3353_v46 }
 0x2d0   : > { %3368 = vmatprep.subr.bf16.mxu1 %v3367_v49 }
 0x2d1   : > { %3370 = vmatpush1.bf16.msra.mxu1 %v3369_v47 }
 0x2d2   : > { %3149 = vmatmul.mubr.msk.f32.vlgmr.msra.gmra.mrb[32].mxu0 %vm603_vm0, %v3133_v63 }
 0x2d3   : > { %1378 = vmatprep.mubr.f32.mxu0 %v4088_v32 }
 0x2d4   : > { %3157 = vmatmul.mubr.msk.f32.vlgmr.msra.gmra.mrb[32].mxu1 %vm603_vm0, %v3133_v63 }
 0x2d5   : > { %1491 = vmatprep.mubr.f32.mxu1 %v4088_v32 }
 0x2d6   : > { %3150 = vmatmul.mubr.msk.f32.gmra.mrb[34].mxu0 %vm603_vm0, %v3134_v31 }
 0x2d7   : > { %1384 = vmatprep.mubr.f32.mxu0 %v4088_v32 }
 0x2d8   : > { %3158 = vmatmul.mubr.msk.f32.gmra.mrb[34].mxu1 %vm603_vm0, %v3134_v31 }
 0x2d9   : > { %1497 = vmatprep.mubr.f32.mxu1 %v4088_v32 }
 0x2da   : > { %3151 = vmatmul.mubr.msk.f32.gmra.mrb[36].mxu0 %vm603_vm0, %v3135_v52 }
 0x2db   : > { %1390 = vmatprep.mubr.f32.mxu0 %v4088_v32 }
 0x2dc   : > { %3159 = vmatmul.mubr.msk.f32.gmra.mrb[36].mxu1 %vm603_vm0, %v3135_v52 }
 0x2dd   : > { %1503 = vmatprep.mubr.f32.mxu1 %v4088_v32 }
 0x2de   : > { %3152 = vmatmul.mubr.msk.f32.gmra.mrb[38].mxu0 %vm603_vm0, %v3136_v60 }
 0x2df   : > { %1396 = vmatprep.mubr.f32.mxu0 %v4088_v32 }
 0x2e0   : > { %3160 = vmatmul.mubr.msk.f32.gmra.mrb[38].mxu1 %vm603_vm0, %v3136_v60 }
 0x2e1   : > { %1509 = vmatprep.mubr.f32.mxu1 %v4088_v32 }
 0x2e2   : > { %3153 = vmatmul.mubr.msk.f32.gmra.mrb[40].mxu0 %vm603_vm0, %v3137_v54 }
 0x2e3   : > { %1402 = vmatprep.mubr.f32.mxu0 %v4088_v32 }
 0x2e4   : > { %3161 = vmatmul.mubr.msk.f32.gmra.mrb[40].mxu1 %vm603_vm0, %v3137_v54 }
 0x2e5   : > { %1515 = vmatprep.mubr.f32.mxu1 %v4088_v32 }
 0x2e6   : > { %3154 = vmatmul.mubr.msk.f32.gmra.mrb[42].mxu0 %vm603_vm0, %v3138_v24 }
 0x2e7   : > { %1408 = vmatprep.mubr.f32.mxu0 %v4088_v32 }
 0x2e8   : > { %3162 = vmatmul.mubr.msk.f32.gmra.mrb[42].mxu1 %vm603_vm0, %v3138_v24 }
 0x2e9   : > { %1521 = vmatprep.mubr.f32.mxu1 %v4088_v32 }
 0x2ea   : > { %3155 = vmatmul.mubr.msk.f32.gmra.mrb[44].mxu0 %vm603_vm0, %v3139_v11 }
 0x2eb   : > { %1414 = vmatprep.mubr.f32.mxu0 %v4088_v32 }
 0x2ec   : > { %3163 = vmatmul.mubr.msk.f32.gmra.mrb[44].mxu1 %vm603_vm0, %v3139_v11  ;;  %v1257_v11 = vpop.permute.xlu0 %1256 }
 0x2ed   : > { %1527 = vmatprep.mubr.f32.mxu1 %v4088_v32 }
 0x2ee   : > { %3156 = vmatmul.mubr.msk.f32.gmra.mrb[46].mxu0 %vm603_vm0, %v3140_v55 }
 0x2ef   : > { %1712 = vmatprep.mubr.f32.mxu0 %v4088_v32 }
 0x2f0   : > { %3164 = vmatmul.mubr.msk.f32.gmra.mrb[46].mxu1 %vm603_vm0, %v3140_v55 }
 0x2f1   : > { %1825 = vmatprep.mubr.f32.mxu1 %v4088_v32 }
 0x3a5   : > { %v1374_v56 = vpop.f32.mrb[32].mxu0 }
 0x3a6   : > { %v1376_v59 = vpop.f32.mrb[33].mxu0  ;;  %v1375_v29 = vadd.f32 %v1374_v56, %v1247_v8  ;;  %v1262_v56 = vpop.permute.xlu1 %1261 }
 0x3a7   : > { %v1487_v2 = vpop.f32.mrb[32].mxu1  ;;  %v1377_v38 = vadd.f32 %v1376_v59, %v1247_v8 }
 0x3a8   : > { %v1489_v10 = vpop.f32.mrb[33].mxu1  ;;  %v1488_v46 = vadd.f32 %v1487_v2, %v1247_v8  ;;  %v4737_v52 = vadd.f32 %v4445_v57, %v1375_v29 }
 0x3a9   : > { %v1380_v15 = vpop.f32.mrb[34].mxu0  ;;  %v1490_v45 = vadd.f32 %v1489_v10, %v1247_v8  ;;  %v4731_v47 = vadd.f32 %v4448_v62, %v1377_v38 }
 0x3aa   : > { %v1381_v41 = vadd.f32 %v1380_v15, %v1252_v14  ;;  %v1382_v26 = vpop.f32.mrb[35].mxu0  ;;  %v4751_v55 = vadd.f32 %v4451_v5, %v1488_v46 }
 0x3ab   : > { %v1493_v50 = vpop.f32.mrb[34].mxu1  ;;  %v1383_v18 = vadd.f32 %v1382_v26, %v1252_v14 }
 0x3ac   : > { %v4728_v51 = vadd.f32 %v4455_v9, %v1381_v41  ;;  %v1494_v13 = vadd.f32 %v1493_v50, %v1252_v14  ;;  %v1495_v4 = vpop.f32.mrb[35].mxu1  ;;  %v4743_v9 = vadd.f32 %v4453_v7, %v1490_v45 }
 0x3ad   : > { %v4734_v49 = vadd.f32 %v4460_v17, %v1383_v18  ;;  %v1496_v63 = vadd.f32 %v1495_v4, %v1252_v14  ;;  %v1386_v31 = vpop.f32.mrb[36].mxu0 }
 0x3ae   : > { %v4740_v60 = vadd.f32 %v4465_v23, %v1494_v13  ;;  %v1388_v54 = vpop.f32.mrb[37].mxu0  ;;  %v3373_v57 = vpack.c.bf16 %v4728_v51, %v4737_v52  ;;  %v1387_v8 = vadd.f32 %v1386_v31, %v1257_v11 }
 0x3af   : > { %v4746_v24 = vadd.f32 %v4467_v27, %v1496_v63  ;;  %v1499_v62 = vpop.f32.mrb[36].mxu1  ;;  %v3371_v17 = vpack.c.bf16 %v4734_v49, %v4731_v47  ;;  %v1389_v59 = vadd.f32 %v1388_v54, %v1257_v11 }
 0x3b0   : > { %v1501_v23 = vpop.f32.mrb[37].mxu1  ;;  %v3389_v27 = vpack.c.bf16 %v4740_v60, %v4751_v55  ;;  %v1500_v29 = vadd.f32 %v1499_v62, %v1257_v11  ;;  %v4769_v4 = vadd.f32 %v4492_v53, %v1387_v8  ;;  %v1267_v62 = vpop.permute.xlu0 %1266 }
 0x3b1   : > { %v1392_v2 = vpop.f32.mrb[38].mxu0  ;;  %3372 = vmatprep.subr.bf16.mxu0 %v3371_v17  ;;  %v3387_v7 = vpack.c.bf16 %v4746_v24, %v4743_v9  ;;  %v1502_v5 = vadd.f32 %v1501_v23, %v1257_v11  ;;  %v4763_v50 = vadd.f32 %v4494_v58, %v1389_v59  ;;  %v1272_v11 = vpop.permute.xlu1 %1271 }
 0x3b2   : > { %v1393_v10 = vadd.f32 %v1392_v2, %v1262_v56  ;;  %v1394_v14 = vpop.f32.mrb[39].mxu0  ;;  %3374 = vmatpush1.bf16.msra.mxu0 %v3373_v57  ;;  %v4783_v17 = vadd.f32 %v4498_v1, %v1500_v29 }
 0x3b3   : > { %v1505_v38 = vpop.f32.mrb[38].mxu1  ;;  %3388 = vmatprep.subr.bf16.mxu1 %v3387_v7  ;;  %v1395_v15 = vadd.f32 %v1394_v14, %v1262_v56 }
 0x3b4   : > { %v4760_v41 = vadd.f32 %v4479_v40, %v1393_v10  ;;  %v1506_v26 = vadd.f32 %v1505_v38, %v1262_v56  ;;  %v1507_v45 = vpop.f32.mrb[39].mxu1  ;;  %3390 = vmatpush1.bf16.msra.mxu1 %v3389_v27  ;;  %v4775_v40 = vadd.f32 %v4503_v6, %v1502_v5 }
 0x3b5   : > { %v4766_v18 = vadd.f32 %v4481_v42, %v1395_v15  ;;  %v1508_v46 = vadd.f32 %v1507_v45, %v1262_v56  ;;  %v1398_v13 = vpop.f32.mrb[40].mxu0 }
 0x3b6   : > { %v4772_v63 = vadd.f32 %v4483_v44, %v1506_v26  ;;  %v1400_v31 = vpop.f32.mrb[41].mxu0  ;;  %v3377_v53 = vpack.c.bf16 %v4760_v41, %v4769_v4  ;;  %v1399_v56 = vadd.f32 %v1398_v13, %v1267_v62 }
 0x3b7   : > { %v4778_v54 = vadd.f32 %v4488_v48, %v1508_v46  ;;  %v1511_v58 = vpop.f32.mrb[40].mxu1  ;;  %v3375_v42 = vpack.c.bf16 %v4766_v18, %v4763_v50  ;;  %v1401_v57 = vadd.f32 %v1400_v31, %v1267_v62 }
 0x3b8   : > { %v1513_v44 = vpop.f32.mrb[41].mxu1  ;;  %v3393_v6 = vpack.c.bf16 %v4772_v63, %v4783_v17  ;;  %v1512_v8 = vadd.f32 %v1511_v58, %v1267_v62  ;;  %v4801_v45 = vadd.f32 %v4519_v21, %v1399_v56  ;;  %v1277_v58 = vpop.permute.xlu0 %1276 }
 0x3b9   : > { %v1404_v23 = vpop.f32.mrb[42].mxu0  ;;  %3376 = vmatprep.subr.bf16.mxu0 %v3375_v42  ;;  %v3391_v48 = vpack.c.bf16 %v4778_v54, %v4775_v40  ;;  %v1514_v1 = vadd.f32 %v1513_v44, %v1267_v62  ;;  %v4795_v38 = vadd.f32 %v4521_v22, %v1401_v57  ;;  %v1282_v62 = vpop.permute.xlu1 %1281 }
 0x3ba   : > { %v1405_v59 = vadd.f32 %v1404_v23, %v1272_v11  ;;  %v1406_v2 = vpop.f32.mrb[43].mxu0  ;;  %3378 = vmatpush1.bf16.msra.mxu0 %v3377_v53  ;;  %v4815_v42 = vadd.f32 %v4525_v25, %v1512_v8 }
 0x3bb   : > { %v1517_v7 = vpop.f32.mrb[42].mxu1  ;;  %3392 = vmatprep.subr.bf16.mxu1 %v3391_v48  ;;  %v1407_v27 = vadd.f32 %v1406_v2, %v1272_v11 }
 0x3bc   : > { %v4792_v10 = vadd.f32 %v4509_v12, %v1405_v59  ;;  %v1518_v14 = vadd.f32 %v1517_v7, %v1272_v11  ;;  %v1519_v5 = vpop.f32.mrb[43].mxu1  ;;  %3394 = vmatpush1.bf16.msra.mxu1 %v3393_v6  ;;  %v4807_v12 = vadd.f32 %v4529_v28, %v1514_v1 }
 0x3bd   : > { %v4798_v15 = vadd.f32 %v4513_v16, %v1407_v27  ;;  %v1520_v29 = vadd.f32 %v1519_v5, %v1272_v11  ;;  %v1410_v26 = vpop.f32.mrb[44].mxu0 }
 0x3be   : > { %v4804_v46 = vadd.f32 %v4515_v19, %v1518_v14  ;;  %v1412_v13 = vpop.f32.mrb[45].mxu0  ;;  %v3381_v21 = vpack.c.bf16 %v4792_v10, %v4801_v45  ;;  %v1411_v11 = vadd.f32 %v1410_v26, %v1277_v58 }
 0x3bf   : > { %v4810_v31 = vadd.f32 %v4517_v20, %v1520_v29  ;;  %v1523_v22 = vpop.f32.mrb[44].mxu1  ;;  %v3379_v16 = vpack.c.bf16 %v4798_v15, %v4795_v38  ;;  %v1413_v53 = vadd.f32 %v1412_v13, %v1277_v58  ;;  %v3168_v13 = vld [vmem:[%s5171_s3 + $0xd8] sm:$0xff] }
 0x3c0   : > { %v1525_v19 = vpop.f32.mrb[45].mxu1  ;;  %v3397_v28 = vpack.c.bf16 %v4804_v46, %v4815_v42  ;;  %v1524_v56 = vadd.f32 %v1523_v22, %v1277_v58  ;;  %v4833_v14 = vadd.f32 %v4543_v36, %v1411_v11  ;;  %v3169_v22 = vld [vmem:[%s5171_s3 + $0xe0] sm:$0xff] }
 0x3c1   : > { %v1416_v44 = vpop.f32.mrb[46].mxu0  ;;  %3380 = vmatprep.subr.bf16.mxu0 %v3379_v16  ;;  %v3395_v20 = vpack.c.bf16 %v4810_v31, %v4807_v12  ;;  %v1526_v25 = vadd.f32 %v1525_v19, %v1277_v58  ;;  %v4827_v7 = vadd.f32 %v4545_v37, %v1413_v53  ;;  %v3170_v16 = vld [vmem:[%s5171_s3 + $0xe8] sm:$0xff]  ;;  %v3171_v58 = vld [vmem:[%s5171_s3 + $0xf0] sm:$0xff]  ;;  %v1587_v19 = vpop.permute.xlu0 %1586 }
 0x3c2   : > { %v1417_v57 = vadd.f32 %v1416_v44, %v1282_v62  ;;  %v1418_v23 = vpop.f32.mrb[47].mxu0  ;;  %3382 = vmatpush1.bf16.msra.mxu0 %v3381_v21  ;;  %v4847_v26 = vadd.f32 %v4549_v39, %v1524_v56  ;;  %v3166_v39 = vld [vmem:[%s5171_s3 + $0xc8] sm:$0xff]  ;;  %v3172_v21 = vld [vmem:[%s5171_s3 + $0xf8] sm:$0xff] }
 0x3c3   : > { %v1529_v48 = vpop.f32.mrb[46].mxu1  ;;  %3396 = vmatprep.subr.bf16.mxu1 %v3395_v20  ;;  %v1419_v6 = vadd.f32 %v1418_v23, %v1282_v62  ;;  %v4839_v29 = vadd.f32 %v4553_v43, %v1526_v25  ;;  %v3167_v43 = vld [vmem:[%s5171_s3 + $0xd0] sm:$0xff]  ;;  %v1592_v23 = vpop.permute.xlu1 %1591 }
 0x3c4   : > { %v4824_v59 = vadd.f32 %v4533_v30, %v1417_v57  ;;  %v1530_v2 = vadd.f32 %v1529_v48, %v1282_v62  ;;  %v1531_v1 = vpop.f32.mrb[47].mxu1  ;;  %3398 = vmatpush1.bf16.msra.mxu1 %v3397_v28 }
 0x3c5   : > { %v4830_v27 = vadd.f32 %v4537_v33, %v1419_v6  ;;  %v1532_v8 = vadd.f32 %v1531_v1, %v1282_v62 }
 0x3c6   : > { %v4836_v5 = vadd.f32 %v4539_v34, %v1530_v2  ;;  %v3385_v33 = vpack.c.bf16 %v4824_v59, %v4833_v14 }
 0x3c7   : > { %v4842_v30 = vadd.f32 %v4541_v35, %v1532_v8  ;;  %v3383_v37 = vpack.c.bf16 %v4830_v27, %v4827_v7  ;;  %v3165_v35 = vld [vmem:[%s5171_s3 + $0xc0] sm:$0xff] }
 0x3c8   : > { %v3401_v36 = vpack.c.bf16 %v4836_v5, %v4847_v26 }
 0x3c9   : > { %3384 = vmatprep.subr.bf16.mxu0 %v3383_v37  ;;  %v3399_v34 = vpack.c.bf16 %v4842_v30, %v4839_v29 }
 0x3ca   : > { %3386 = vmatpush1.bf16.msra.mxu0 %v3385_v33  ;;  %v1597_v33 = vpop.permute.xlu0 %1596 }
 0x3cb   : > { %3400 = vmatprep.subr.bf16.mxu1 %v3399_v34 }
 0x3cc   : > { %3402 = vmatpush1.bf16.msra.mxu1 %v3401_v36 }
 0x3cd   : > { %3181 = vmatmul.mubr.msk.f32.vlgmr.msra.gmra.mrb[48].mxu0 %vm603_vm0, %v3165_v35 }
 0x3ce   : > { %1718 = vmatprep.mubr.f32.mxu0 %v4088_v32 }
 0x3cf   : > { %3189 = vmatmul.mubr.msk.f32.vlgmr.msra.gmra.mrb[48].mxu1 %vm603_vm0, %v3165_v35 }
 0x3d0   : > { %1831 = vmatprep.mubr.f32.mxu1 %v4088_v32 }
 0x3d1   : > { %3182 = vmatmul.mubr.msk.f32.gmra.mrb[50].mxu0 %vm603_vm0, %v3166_v39 }
 0x3d2   : > { %1724 = vmatprep.mubr.f32.mxu0 %v4088_v32 }
 0x3d3   : > { %3190 = vmatmul.mubr.msk.f32.gmra.mrb[50].mxu1 %vm603_vm0, %v3166_v39 }
 0x3d4   : > { %1837 = vmatprep.mubr.f32.mxu1 %v4088_v32 }
 0x3d5   : > { %3183 = vmatmul.mubr.msk.f32.gmra.mrb[52].mxu0 %vm603_vm0, %v3167_v43 }
 0x3d6   : > { %1730 = vmatprep.mubr.f32.mxu0 %v4088_v32 }
 0x3d7   : > { %3191 = vmatmul.mubr.msk.f32.gmra.mrb[52].mxu1 %vm603_vm0, %v3167_v43 }
 0x3d8   : > { %1843 = vmatprep.mubr.f32.mxu1 %v4088_v32 }
 0x3d9   : > { %3184 = vmatmul.mubr.msk.f32.gmra.mrb[54].mxu0 %vm603_vm0, %v3168_v13 }
 0x3da   : > { %1736 = vmatprep.mubr.f32.mxu0 %v4088_v32 }
 0x3db   : > { %3192 = vmatmul.mubr.msk.f32.gmra.mrb[54].mxu1 %vm603_vm0, %v3168_v13 }
 0x3dc   : > { %1849 = vmatprep.mubr.f32.mxu1 %v4088_v32 }
 0x3dd   : > { %3185 = vmatmul.mubr.msk.f32.gmra.mrb[56].mxu0 %vm603_vm0, %v3169_v22 }
 0x3de   : > { %1742 = vmatprep.mubr.f32.mxu0 %v4088_v32 }
 0x3df   : > { %3193 = vmatmul.mubr.msk.f32.gmra.mrb[56].mxu1 %vm603_vm0, %v3169_v22 }
 0x3e0   : > { %1855 = vmatprep.mubr.f32.mxu1 %v4088_v32 }
 0x3e1   : > { %3186 = vmatmul.mubr.msk.f32.gmra.mrb[58].mxu0 %vm603_vm0, %v3170_v16 }
 0x3e2   : > { %1748 = vmatprep.mubr.f32.mxu0 %v4088_v32 }
 0x3e3   : > { %3194 = vmatmul.mubr.msk.f32.gmra.mrb[58].mxu1 %vm603_vm0, %v3170_v16 }
 0x3e4   : > { %1861 = vmatprep.mubr.f32.mxu1 %v4088_v32 }
 0x3e5   : > { %3187 = vmatmul.mubr.msk.f32.gmra.mrb[60].mxu0 %vm603_vm0, %v3171_v58 }
 0x3e6   : > { %1754 = vmatprep.mubr.f32.mxu0 %v4088_v32 }
 0x3e7   : > { %3195 = vmatmul.mubr.msk.f32.gmra.mrb[60].mxu1 %vm603_vm0, %v3171_v58  ;;  %v1602_v58 = vpop.permute.xlu1 %1601 }
 0x3e8   : > { %1867 = vmatprep.mubr.f32.mxu1 %v4088_v32 }
 0x3e9   : > { %3188 = vmatmul.mubr.msk.f32.gmra.mrb[62].mxu0 %vm603_vm0, %v3172_v21 }
 0x3ea   : > { %2052 = vmatprep.mubr.f32.mxu0 %v4088_v32 }
 0x3eb   : > { %3196 = vmatmul.mubr.msk.f32.gmra.mrb[62].mxu1 %vm603_vm0, %v3172_v21 }
 0x3ec   : > { %2165 = vmatprep.mubr.f32.mxu1 %v4088_v32 }
 0x4a0   : > { %v1714_v62 = vpop.f32.mrb[48].mxu0 }
 0x4a1   : > { %v1715_v53 = vadd.f32 %v1714_v62, %v1587_v19  ;;  %v1716_v44 = vpop.f32.mrb[49].mxu0 }
 0x4a2   : > { %v1827_v20 = vpop.f32.mrb[48].mxu1  ;;  %v1717_v28 = vadd.f32 %v1716_v44, %v1587_v19 }
 0x4a3   : > { %3735 = vtanh.f32 %v1715_v53  ;;  %v1828_v11 = vadd.f32 %v1827_v20, %v1587_v19  ;;  %v1829_v57 = vpop.f32.mrb[49].mxu1 }
 0x4a4   : > { %3737 = vtanh.f32 %v1717_v28  ;;  %v1830_v25 = vadd.f32 %v1829_v57, %v1587_v19  ;;  %v1720_v48 = vpop.f32.mrb[50].mxu0 }
 0x4a5   : > { %3739 = vtanh.f32 %v1828_v11  ;;  %v1721_v6 = vadd.f32 %v1720_v48, %v1592_v23  ;;  %v1722_v56 = vpop.f32.mrb[51].mxu0 }
 0x4a6   : > { %3741 = vtanh.f32 %v1830_v25  ;;  %v1833_v2 = vpop.f32.mrb[50].mxu1  ;;  %v1723_v1 = vadd.f32 %v1722_v56, %v1592_v23 }
 0x4a7   : > { %3743 = vtanh.f32 %v1721_v6  ;;  %v1834_v8 = vadd.f32 %v1833_v2, %v1592_v23  ;;  %v1835_v37 = vpop.f32.mrb[51].mxu1  ;;  %v1607_v6 = vpop.permute.xlu0 %1606 }
 0x4a8   : > { %3745 = vtanh.f32 %v1723_v1  ;;  %v1836_v34 = vadd.f32 %v1835_v37, %v1592_v23  ;;  %v1726_v36 = vpop.f32.mrb[52].mxu0 }
 0x4a9   : > { %3747 = vtanh.f32 %v1834_v8  ;;  %v1727_v35 = vadd.f32 %v1726_v36, %v1597_v33  ;;  %v1728_v39 = vpop.f32.mrb[53].mxu0 }
 0x4aa   : > { %3749 = vtanh.f32 %v1836_v34  ;;  %v1839_v43 = vpop.f32.mrb[52].mxu1  ;;  %v1729_v13 = vadd.f32 %v1728_v39, %v1597_v33 }
 0x4ab   : > { %3751 = vtanh.f32 %v1727_v35  ;;  %v1840_v22 = vadd.f32 %v1839_v43, %v1597_v33  ;;  %v1841_v16 = vpop.f32.mrb[53].mxu1 }
 0x4ac   : > { %3753 = vtanh.f32 %v1729_v13  ;;  %v1842_v21 = vadd.f32 %v1841_v16, %v1597_v33  ;;  %v1732_v19 = vpop.f32.mrb[54].mxu0 }
 0x4ad   : > { %v3736_v62 = vpop.eup %3735  ;;  %3755 = vtanh.f32 %v1840_v22  ;;  %v1733_v53 = vadd.f32 %v1732_v19, %v1602_v58  ;;  %v1734_v44 = vpop.f32.mrb[55].mxu0 }
 0x4ae   : > { %v3738_v20 = vpop.eup %3737  ;;  %3757 = vtanh.f32 %v1842_v21  ;;  %v1845_v28 = vpop.f32.mrb[54].mxu1  ;;  %v1735_v11 = vadd.f32 %v1734_v44, %v1602_v58 }
 0x4af   : > { %v3740_v57 = vpop.eup %3739  ;;  %3759 = vtanh.f32 %v1733_v53  ;;  %v1846_v23 = vadd.f32 %v1845_v28, %v1602_v58  ;;  %v1847_v25 = vpop.f32.mrb[55].mxu1 }
 0x4b0   : > { %v3742_v48 = vpop.eup %3741  ;;  %3761 = vtanh.f32 %v1735_v11  ;;  %v1848_v56 = vadd.f32 %v1847_v25, %v1602_v58  ;;  %v1738_v2 = vpop.f32.mrb[56].mxu0 }
 0x4b1   : > { %v3744_v1 = vpop.eup %3743  ;;  %3763 = vtanh.f32 %v1846_v23  ;;  %v1739_v8 = vadd.f32 %v1738_v2, %v1607_v6  ;;  %v1740_v37 = vpop.f32.mrb[57].mxu0 }
 0x4b2   : > { %v3746_v33 = vpop.eup %3745  ;;  %3765 = vtanh.f32 %v1848_v56  ;;  %v1851_v34 = vpop.f32.mrb[56].mxu1  ;;  %v1741_v36 = vadd.f32 %v1740_v37, %v1607_v6  ;;  %v3405_v35 = vpack.c.bf16 %v3744_v1, %v3736_v62 }
 0x4b3   : > { %v3748_v39 = vpop.eup %3747  ;;  %3767 = vtanh.f32 %v1739_v8  ;;  %v1852_v43 = vadd.f32 %v1851_v34, %v1607_v6  ;;  %v1853_v13 = vpop.f32.mrb[57].mxu1  ;;  %v3403_v22 = vpack.c.bf16 %v3746_v33, %v3738_v20 }
 0x4b4   : > { %v3750_v16 = vpop.eup %3749  ;;  %v1612_v21 = vpop.permute.xlu1 %1611  ;;  %3769 = vtanh.f32 %v1741_v36  ;;  %v1854_v19 = vadd.f32 %v1853_v13, %v1607_v6  ;;  %v3421_v53 = vpack.c.bf16 %v3748_v39, %v3740_v57 }
 0x4b5   : > { %v1744_v58 = vpop.f32.mrb[58].mxu0  ;;  %v3752_v44 = vpop.eup %3751  ;;  %3771 = vtanh.f32 %v1852_v43  ;;  %3404 = vmatprep.subr.bf16.mxu0 %v3403_v22  ;;  %v3419_v23 = vpack.c.bf16 %v3750_v16, %v3742_v48 }
 0x4b6   : > { %v1745_v28 = vadd.f32 %v1744_v58, %v1612_v21  ;;  %v1746_v11 = vpop.f32.mrb[59].mxu0  ;;  %v3754_v25 = vpop.eup %3753  ;;  %3773 = vtanh.f32 %v1854_v19  ;;  %3406 = vmatpush1.bf16.msra.mxu0 %v3405_v35 }
 0x4b7   : > { %v1857_v62 = vpop.f32.mrb[58].mxu1  ;;  %v1747_v56 = vadd.f32 %v1746_v11, %v1612_v21  ;;  %v3756_v2 = vpop.eup %3755  ;;  %3420 = vmatprep.subr.bf16.mxu1 %v3419_v23 }
 0x4b8   : > { %3775 = vtanh.f32 %v1745_v28  ;;  %v1858_v20 = vadd.f32 %v1857_v62, %v1612_v21  ;;  %v1859_v1 = vpop.f32.mrb[59].mxu1  ;;  %v3758_v8 = vpop.eup %3757  ;;  %3422 = vmatpush1.bf16.msra.mxu1 %v3421_v53 }
 0x4b9   : > { %v1617_v6 = vpop.permute.xlu0 %1616  ;;  %3777 = vtanh.f32 %v1747_v56  ;;  %v1860_v57 = vadd.f32 %v1859_v1, %v1612_v21  ;;  %v1750_v37 = vpop.f32.mrb[60].mxu0 }
 0x4ba   : > { %v3760_v33 = vpop.eup %3759  ;;  %3779 = vtanh.f32 %v1858_v20  ;;  %v1751_v34 = vadd.f32 %v1750_v37, %v1617_v6  ;;  %v1752_v48 = vpop.f32.mrb[61].mxu0 }
 0x4bb   : > { %v3762_v36 = vpop.eup %3761  ;;  %3781 = vtanh.f32 %v1860_v57  ;;  %v1863_v39 = vpop.f32.mrb[60].mxu1  ;;  %v1753_v43 = vadd.f32 %v1752_v48, %v1617_v6  ;;  %v3409_v35 = vpack.c.bf16 %v3760_v33, %v3752_v44 }
 0x4bc   : > { %v3764_v13 = vpop.eup %3763  ;;  %3783 = vtanh.f32 %v1751_v34  ;;  %v1864_v22 = vadd.f32 %v1863_v39, %v1617_v6  ;;  %v1865_v16 = vpop.f32.mrb[61].mxu1  ;;  %v3407_v19 = vpack.c.bf16 %v3762_v36, %v3754_v25 }
 0x4bd   : > { %v3766_v58 = vpop.eup %3765  ;;  %v1622_v28 = vpop.permute.xlu1 %1621  ;;  %3785 = vtanh.f32 %v1753_v43  ;;  %v1866_v21 = vadd.f32 %v1865_v16, %v1617_v6  ;;  %v3425_v11 = vpack.c.bf16 %v3764_v13, %v3756_v2 }
 0x4be   : > { %v1756_v53 = vpop.f32.mrb[62].mxu0  ;;  %v3768_v23 = vpop.eup %3767  ;;  %3787 = vtanh.f32 %v1864_v22  ;;  %3408 = vmatprep.subr.bf16.mxu0 %v3407_v19  ;;  %v3423_v20 = vpack.c.bf16 %v3766_v58, %v3758_v8 }
 0x4bf   : > { %v1757_v62 = vadd.f32 %v1756_v53, %v1622_v28  ;;  %v1758_v56 = vpop.f32.mrb[63].mxu0  ;;  %v3770_v1 = vpop.eup %3769  ;;  %3789 = vtanh.f32 %v1866_v21  ;;  %3410 = vmatpush1.bf16.msra.mxu0 %v3409_v35 }
 0x4c0   : > { %v1869_v44 = vpop.f32.mrb[62].mxu1  ;;  %v1759_v57 = vadd.f32 %v1758_v56, %v1622_v28  ;;  %v3772_v37 = vpop.eup %3771  ;;  %3424 = vmatprep.subr.bf16.mxu1 %v3423_v20 }
 0x4c1   : > { %3791 = vtanh.f32 %v1757_v62  ;;  %v1870_v25 = vadd.f32 %v1869_v44, %v1622_v28  ;;  %v1871_v33 = vpop.f32.mrb[63].mxu1  ;;  %v3774_v34 = vpop.eup %3773  ;;  %3426 = vmatpush1.bf16.msra.mxu1 %v3425_v11  ;;  %v3198_v44 = vld [vmem:[%s5171_s3 + $0x108] sm:$0xff] }
 0x4c2   : > { %3793 = vtanh.f32 %v1759_v57  ;;  %v1872_v6 = vadd.f32 %v1871_v33, %v1622_v28  ;;  %v3776_v2 = vpop.eup %3775  ;;  %v3199_v57 = vld [vmem:[%s5171_s3 + $0x110] sm:$0xff]  ;;  %v3202_v33 = vld [vmem:[%s5171_s3 + $0x128] sm:$0xff] }
 0x4c3   : > { %3795 = vtanh.f32 %v1870_v25  ;;  %v3778_v48 = vpop.eup %3777  ;;  %v3413_v36 = vpack.c.bf16 %v3776_v2, %v3768_v23  ;;  %v3201_v25 = vld [vmem:[%s5171_s3 + $0x120] sm:$0xff]  ;;  %v1927_v2 = vpop.permute.xlu0 %1926 }
 0x4c4   : > { %3797 = vtanh.f32 %v1872_v6  ;;  %v3780_v8 = vpop.eup %3779  ;;  %v3411_v39 = vpack.c.bf16 %v3778_v48, %v3770_v1  ;;  %v3197_v1 = vld [vmem:[%s5171_s3 + $0x100] sm:$0xff]  ;;  %v3204_v6 = vld [vmem:[%s5171_s3 + $0x138] sm:$0xff] }
 0x4c5   : > { %v3782_v43 = vpop.eup %3781  ;;  %v3429_v13 = vpack.c.bf16 %v3780_v8, %v3772_v37  ;;  %v3200_v37 = vld [vmem:[%s5171_s3 + $0x118] sm:$0xff] }
 0x4c6   : > { %v3784_v22 = vpop.eup %3783  ;;  %3412 = vmatprep.subr.bf16.mxu0 %v3411_v39  ;;  %v3427_v35 = vpack.c.bf16 %v3782_v43, %v3774_v34  ;;  %v3203_v34 = vld [vmem:[%s5171_s3 + $0x130] sm:$0xff] }
 0x4c7   : > { %v3786_v16 = vpop.eup %3785  ;;  %3414 = vmatpush1.bf16.msra.mxu0 %v3413_v36 }
 0x4c8   : > { %v3788_v19 = vpop.eup %3787  ;;  %3428 = vmatprep.subr.bf16.mxu1 %v3427_v35  ;;  %v1932_v35 = vpop.permute.xlu1 %1931 }
 0x4c9   : > { %v3790_v58 = vpop.eup %3789  ;;  %3430 = vmatpush1.bf16.msra.mxu1 %v3429_v13 }
 0x4cb   : > { %v3792_v28 = vpop.eup %3791 }
 0x4cc   : > { %v3794_v21 = vpop.eup %3793  ;;  %v3417_v53 = vpack.c.bf16 %v3792_v28, %v3784_v22 }
 0x4cd   : > { %v3796_v11 = vpop.eup %3795  ;;  %v3415_v62 = vpack.c.bf16 %v3794_v21, %v3786_v16 }
 0x4ce   : > { %v3798_v56 = vpop.eup %3797  ;;  %v3433_v23 = vpack.c.bf16 %v3796_v11, %v3788_v19 }
 0x4cf   : > { %3416 = vmatprep.subr.bf16.mxu0 %v3415_v62  ;;  %v3431_v20 = vpack.c.bf16 %v3798_v56, %v3790_v58  ;;  %v1937_v56 = vpop.permute.xlu0 %1936 }
 0x4d0   : > { %3418 = vmatpush1.bf16.msra.mxu0 %v3417_v53 }
 0x4d1   : > { %3432 = vmatprep.subr.bf16.mxu1 %v3431_v20 }
 0x4d2   : > { %3434 = vmatpush1.bf16.msra.mxu1 %v3433_v23 }
 0x4d3   : > { %3213 = vmatmul.mubr.msk.f32.vlgmr.msra.gmra.mrb[64].mxu0 %vm603_vm0, %v3197_v1 }
 0x4d4   : > { %2058 = vmatprep.mubr.f32.mxu0 %v4088_v32 }
 0x4d5   : > { %3221 = vmatmul.mubr.msk.f32.vlgmr.msra.gmra.mrb[64].mxu1 %vm603_vm0, %v3197_v1 }
 0x4d6   : > { %2171 = vmatprep.mubr.f32.mxu1 %v4088_v32 }
 0x4d7   : > { %3214 = vmatmul.mubr.msk.f32.gmra.mrb[66].mxu0 %vm603_vm0, %v3198_v44 }
 0x4d8   : > { %2064 = vmatprep.mubr.f32.mxu0 %v4088_v32 }
 0x4d9   : > { %3222 = vmatmul.mubr.msk.f32.gmra.mrb[66].mxu1 %vm603_vm0, %v3198_v44 }
 0x4da   : > { %2177 = vmatprep.mubr.f32.mxu1 %v4088_v32 }
 0x4db   : > { %3215 = vmatmul.mubr.msk.f32.gmra.mrb[68].mxu0 %vm603_vm0, %v3199_v57 }
 0x4dc   : > { %2070 = vmatprep.mubr.f32.mxu0 %v4088_v32 }
 0x4dd   : > { %3223 = vmatmul.mubr.msk.f32.gmra.mrb[68].mxu1 %vm603_vm0, %v3199_v57 }
 0x4de   : > { %2183 = vmatprep.mubr.f32.mxu1 %v4088_v32 }
 0x4df   : > { %3216 = vmatmul.mubr.msk.f32.gmra.mrb[70].mxu0 %vm603_vm0, %v3200_v37 }
 0x4e0   : > { %2076 = vmatprep.mubr.f32.mxu0 %v4088_v32 }
 0x4e1   : > { %3224 = vmatmul.mubr.msk.f32.gmra.mrb[70].mxu1 %vm603_vm0, %v3200_v37 }
 0x4e2   : > { %2189 = vmatprep.mubr.f32.mxu1 %v4088_v32 }
 0x4e3   : > { %3217 = vmatmul.mubr.msk.f32.gmra.mrb[72].mxu0 %vm603_vm0, %v3201_v25 }
 0x4e4   : > { %2082 = vmatprep.mubr.f32.mxu0 %v4088_v32 }
 0x4e5   : > { %3225 = vmatmul.mubr.msk.f32.gmra.mrb[72].mxu1 %vm603_vm0, %v3201_v25 }
 0x4e6   : > { %2195 = vmatprep.mubr.f32.mxu1 %v4088_v32 }
 0x4e7   : > { %3218 = vmatmul.mubr.msk.f32.gmra.mrb[74].mxu0 %vm603_vm0, %v3202_v33 }
 0x4e8   : > { %2088 = vmatprep.mubr.f32.mxu0 %v4088_v32 }
 0x4e9   : > { %3226 = vmatmul.mubr.msk.f32.gmra.mrb[74].mxu1 %vm603_vm0, %v3202_v33 }
 0x4ea   : > { %2201 = vmatprep.mubr.f32.mxu1 %v4088_v32 }
 0x4eb   : > { %3219 = vmatmul.mubr.msk.f32.gmra.mrb[76].mxu0 %vm603_vm0, %v3203_v34 }
 0x4ec   : > { %2094 = vmatprep.mubr.f32.mxu0 %v4088_v32 }
 0x4ed   : > { %3227 = vmatmul.mubr.msk.f32.gmra.mrb[76].mxu1 %vm603_vm0, %v3203_v34  ;;  %v1942_v34 = vpop.permute.xlu1 %1941 }
 0x4ee   : > { %2207 = vmatprep.mubr.f32.mxu1 %v4088_v32 }
 0x4ef   : > { %3220 = vmatmul.mubr.msk.f32.gmra.mrb[78].mxu0 %vm603_vm0, %v3204_v6 }
 0x4f0   : > { %2392 = vmatprep.mubr.f32.mxu0 %v4088_v32 }
 0x4f1   : > { %3228 = vmatmul.mubr.msk.f32.gmra.mrb[78].mxu1 %vm603_vm0, %v3204_v6 }
 0x4f2   : > { %2505 = vmatprep.mubr.f32.mxu1 %v4088_v32 }
 0x5a6   : > { %v2054_v48 = vpop.f32.mrb[64].mxu0 }
 0x5a7   : > { %v2055_v36 = vadd.f32 %v2054_v48, %v1927_v2  ;;  %v2056_v8 = vpop.f32.mrb[65].mxu0 }
 0x5a8   : > { %v2167_v39 = vpop.f32.mrb[64].mxu1  ;;  %v2057_v43 = vadd.f32 %v2056_v8, %v1927_v2 }
 0x5a9   : > { %3799 = vtanh.f32 %v2055_v36  ;;  %v2168_v13 = vadd.f32 %v2167_v39, %v1927_v2  ;;  %v2169_v22 = vpop.f32.mrb[65].mxu1 }
 0x5aa   : > { %3801 = vtanh.f32 %v2057_v43  ;;  %v2170_v16 = vadd.f32 %v2169_v22, %v1927_v2  ;;  %v2060_v19 = vpop.f32.mrb[66].mxu0 }
 0x5ab   : > { %3803 = vtanh.f32 %v2168_v13  ;;  %v2061_v58 = vadd.f32 %v2060_v19, %v1932_v35  ;;  %v2062_v28 = vpop.f32.mrb[67].mxu0 }
 0x5ac   : > { %3805 = vtanh.f32 %v2170_v16  ;;  %v2173_v21 = vpop.f32.mrb[66].mxu1  ;;  %v2063_v53 = vadd.f32 %v2062_v28, %v1932_v35 }
 0x5ad   : > { %3807 = vtanh.f32 %v2061_v58  ;;  %v2174_v11 = vadd.f32 %v2173_v21, %v1932_v35  ;;  %v2175_v62 = vpop.f32.mrb[67].mxu1  ;;  %v1947_v58 = vpop.permute.xlu0 %1946 }
 0x5ae   : > { %3809 = vtanh.f32 %v2063_v53  ;;  %v2176_v23 = vadd.f32 %v2175_v62, %v1932_v35  ;;  %v2066_v20 = vpop.f32.mrb[68].mxu0 }
 0x5af   : > { %3811 = vtanh.f32 %v2174_v11  ;;  %v2067_v1 = vadd.f32 %v2066_v20, %v1937_v56  ;;  %v2068_v44 = vpop.f32.mrb[69].mxu0 }
 0x5b0   : > { %3813 = vtanh.f32 %v2176_v23  ;;  %v2179_v57 = vpop.f32.mrb[68].mxu1  ;;  %v2069_v37 = vadd.f32 %v2068_v44, %v1937_v56 }
 0x5b1   : > { %3815 = vtanh.f32 %v2067_v1  ;;  %v2180_v25 = vadd.f32 %v2179_v57, %v1937_v56  ;;  %v2181_v33 = vpop.f32.mrb[69].mxu1 }
 0x5b2   : > { %3817 = vtanh.f32 %v2069_v37  ;;  %v2182_v6 = vadd.f32 %v2181_v33, %v1937_v56  ;;  %v2072_v2 = vpop.f32.mrb[70].mxu0 }
 0x5b3   : > { %v3800_v48 = vpop.eup %3799  ;;  %3819 = vtanh.f32 %v2180_v25  ;;  %v2073_v36 = vadd.f32 %v2072_v2, %v1942_v34  ;;  %v2074_v8 = vpop.f32.mrb[71].mxu0 }
 0x5b4   : > { %v3802_v39 = vpop.eup %3801  ;;  %3821 = vtanh.f32 %v2182_v6  ;;  %v2185_v43 = vpop.f32.mrb[70].mxu1  ;;  %v2075_v13 = vadd.f32 %v2074_v8, %v1942_v34 }
 0x5b5   : > { %v3804_v22 = vpop.eup %3803  ;;  %3823 = vtanh.f32 %v2073_v36  ;;  %v2186_v35 = vadd.f32 %v2185_v43, %v1942_v34  ;;  %v2187_v16 = vpop.f32.mrb[71].mxu1 }
 0x5b6   : > { %v3806_v19 = vpop.eup %3805  ;;  %3825 = vtanh.f32 %v2075_v13  ;;  %v2188_v28 = vadd.f32 %v2187_v16, %v1942_v34  ;;  %v2078_v21 = vpop.f32.mrb[72].mxu0 }
 0x5b7   : > { %v3808_v53 = vpop.eup %3807  ;;  %3827 = vtanh.f32 %v2186_v35  ;;  %v2079_v11 = vadd.f32 %v2078_v21, %v1947_v58  ;;  %v2080_v62 = vpop.f32.mrb[73].mxu0 }
 0x5b8   : > { %v3810_v56 = vpop.eup %3809  ;;  %3829 = vtanh.f32 %v2188_v28  ;;  %v2191_v23 = vpop.f32.mrb[72].mxu1  ;;  %v2081_v20 = vadd.f32 %v2080_v62, %v1947_v58  ;;  %v3437_v1 = vpack.c.bf16 %v3808_v53, %v3800_v48 }
 0x5b9   : > { %v3812_v44 = vpop.eup %3811  ;;  %3831 = vtanh.f32 %v2079_v11  ;;  %v2192_v57 = vadd.f32 %v2191_v23, %v1947_v58  ;;  %v2193_v37 = vpop.f32.mrb[73].mxu1  ;;  %v3435_v25 = vpack.c.bf16 %v3810_v56, %v3802_v39 }
 0x5ba   : > { %v3814_v33 = vpop.eup %3813  ;;  %v1952_v6 = vpop.permute.xlu1 %1951  ;;  %3833 = vtanh.f32 %v2081_v20  ;;  %v2194_v2 = vadd.f32 %v2193_v37, %v1947_v58  ;;  %v3453_v36 = vpack.c.bf16 %v3812_v44, %v3804_v22 }
 0x5bb   : > { %v2084_v34 = vpop.f32.mrb[74].mxu0  ;;  %v3816_v8 = vpop.eup %3815  ;;  %3835 = vtanh.f32 %v2192_v57  ;;  %3436 = vmatprep.subr.bf16.mxu0 %v3435_v25  ;;  %v3451_v35 = vpack.c.bf16 %v3814_v33, %v3806_v19 }
 0x5bc   : > { %v2085_v43 = vadd.f32 %v2084_v34, %v1952_v6  ;;  %v2086_v13 = vpop.f32.mrb[75].mxu0  ;;  %v3818_v16 = vpop.eup %3817  ;;  %3837 = vtanh.f32 %v2194_v2  ;;  %3438 = vmatpush1.bf16.msra.mxu0 %v3437_v1 }
 0x5bd   : > { %v2197_v48 = vpop.f32.mrb[74].mxu1  ;;  %v2087_v28 = vadd.f32 %v2086_v13, %v1952_v6  ;;  %v3820_v21 = vpop.eup %3819  ;;  %3452 = vmatprep.subr.bf16.mxu1 %v3451_v35 }
 0x5be   : > { %3839 = vtanh.f32 %v2085_v43  ;;  %v2198_v39 = vadd.f32 %v2197_v48, %v1952_v6  ;;  %v2199_v53 = vpop.f32.mrb[75].mxu1  ;;  %v3822_v11 = vpop.eup %3821  ;;  %3454 = vmatpush1.bf16.msra.mxu1 %v3453_v36 }
 0x5bf   : > { %v1957_v58 = vpop.permute.xlu0 %1956  ;;  %3841 = vtanh.f32 %v2087_v28  ;;  %v2200_v22 = vadd.f32 %v2199_v53, %v1952_v6  ;;  %v2090_v62 = vpop.f32.mrb[76].mxu0 }
 0x5c0   : > { %v3824_v56 = vpop.eup %3823  ;;  %3843 = vtanh.f32 %v2198_v39  ;;  %v2091_v23 = vadd.f32 %v2090_v62, %v1957_v58  ;;  %v2092_v19 = vpop.f32.mrb[77].mxu0 }
 0x5c1   : > { %v3826_v20 = vpop.eup %3825  ;;  %3845 = vtanh.f32 %v2200_v22  ;;  %v2203_v44 = vpop.f32.mrb[76].mxu1  ;;  %v2093_v57 = vadd.f32 %v2092_v19, %v1957_v58  ;;  %v3441_v1 = vpack.c.bf16 %v3824_v56, %v3816_v8 }
 0x5c2   : > { %v3828_v37 = vpop.eup %3827  ;;  %3847 = vtanh.f32 %v2091_v23  ;;  %v2204_v25 = vadd.f32 %v2203_v44, %v1957_v58  ;;  %v2205_v33 = vpop.f32.mrb[77].mxu1  ;;  %v3439_v2 = vpack.c.bf16 %v3826_v20, %v3818_v16 }
 0x5c3   : > { %v3830_v34 = vpop.eup %3829  ;;  %v1962_v43 = vpop.permute.xlu1 %1961  ;;  %3849 = vtanh.f32 %v2093_v57  ;;  %v2206_v6 = vadd.f32 %v2205_v33, %v1957_v58  ;;  %v3457_v13 = vpack.c.bf16 %v3828_v37, %v3820_v21 }
 0x5c4   : > { %v2096_v36 = vpop.f32.mrb[78].mxu0  ;;  %v3832_v35 = vpop.eup %3831  ;;  %3851 = vtanh.f32 %v2204_v25  ;;  %3440 = vmatprep.subr.bf16.mxu0 %v3439_v2  ;;  %v3455_v39 = vpack.c.bf16 %v3830_v34, %v3822_v11 }
 0x5c5   : > { %v2097_v48 = vadd.f32 %v2096_v36, %v1962_v43  ;;  %v2098_v28 = vpop.f32.mrb[79].mxu0  ;;  %v3834_v53 = vpop.eup %3833  ;;  %3853 = vtanh.f32 %v2206_v6  ;;  %3442 = vmatpush1.bf16.msra.mxu0 %v3441_v1 }
 0x5c6   : > { %v2209_v8 = vpop.f32.mrb[78].mxu1  ;;  %v2099_v22 = vadd.f32 %v2098_v28, %v1962_v43  ;;  %v3836_v62 = vpop.eup %3835  ;;  %3456 = vmatprep.subr.bf16.mxu1 %v3455_v39 }
 0x5c7   : > { %3855 = vtanh.f32 %v2097_v48  ;;  %v2210_v16 = vadd.f32 %v2209_v8, %v1962_v43  ;;  %v2211_v56 = vpop.f32.mrb[79].mxu1  ;;  %v3838_v23 = vpop.eup %3837  ;;  %3458 = vmatpush1.bf16.msra.mxu1 %v3457_v13  ;;  %v3230_v8 = vld [vmem:[%s5171_s3 + $0x148] sm:$0xff] }
 0x5c8   : > { %3857 = vtanh.f32 %v2099_v22  ;;  %v2212_v58 = vadd.f32 %v2211_v56, %v1962_v43  ;;  %v3840_v21 = vpop.eup %3839  ;;  %v3231_v22 = vld [vmem:[%s5171_s3 + $0x150] sm:$0xff]  ;;  %v3234_v56 = vld [vmem:[%s5171_s3 + $0x168] sm:$0xff] }
 0x5c9   : > { %3859 = vtanh.f32 %v2210_v16  ;;  %v3842_v19 = vpop.eup %3841  ;;  %v3445_v20 = vpack.c.bf16 %v3840_v21, %v3832_v35  ;;  %v3233_v16 = vld [vmem:[%s5171_s3 + $0x160] sm:$0xff]  ;;  %v2267_v21 = vpop.permute.xlu0 %2266 }
 0x5ca   : > { %3861 = vtanh.f32 %v2212_v58  ;;  %v3844_v11 = vpop.eup %3843  ;;  %v3443_v44 = vpack.c.bf16 %v3842_v19, %v3834_v53  ;;  %v3229_v53 = vld [vmem:[%s5171_s3 + $0x140] sm:$0xff]  ;;  %v3236_v58 = vld [vmem:[%s5171_s3 + $0x178] sm:$0xff] }
 0x5cb   : > { %v3846_v57 = vpop.eup %3845  ;;  %v3461_v37 = vpack.c.bf16 %v3844_v11, %v3836_v62  ;;  %v3232_v62 = vld [vmem:[%s5171_s3 + $0x158] sm:$0xff] }
 0x5cc   : > { %v3848_v25 = vpop.eup %3847  ;;  %3444 = vmatprep.subr.bf16.mxu0 %v3443_v44  ;;  %v3459_v1 = vpack.c.bf16 %v3846_v57, %v3838_v23  ;;  %v3235_v23 = vld [vmem:[%s5171_s3 + $0x170] sm:$0xff] }
 0x5cd   : > { %v3850_v33 = vpop.eup %3849  ;;  %3446 = vmatpush1.bf16.msra.mxu0 %v3445_v20 }
 0x5ce   : > { %v3852_v2 = vpop.eup %3851  ;;  %3460 = vmatprep.subr.bf16.mxu1 %v3459_v1  ;;  %v2272_v1 = vpop.permute.xlu1 %2271 }
 0x5cf   : > { %v3854_v34 = vpop.eup %3853  ;;  %3462 = vmatpush1.bf16.msra.mxu1 %v3461_v37 }
 0x5d1   : > { %v3856_v43 = vpop.eup %3855 }
 0x5d2   : > { %v3858_v6 = vpop.eup %3857  ;;  %v3449_v36 = vpack.c.bf16 %v3856_v43, %v3848_v25 }
 0x5d3   : > { %v3860_v13 = vpop.eup %3859  ;;  %v3447_v48 = vpack.c.bf16 %v3858_v6, %v3850_v33 }
 0x5d4   : > { %v3862_v28 = vpop.eup %3861  ;;  %v3465_v35 = vpack.c.bf16 %v3860_v13, %v3852_v2 }
 0x5d5   : > { %3448 = vmatprep.subr.bf16.mxu0 %v3447_v48  ;;  %v3463_v39 = vpack.c.bf16 %v3862_v28, %v3854_v34  ;;  %v2277_v28 = vpop.permute.xlu0 %2276 }
 0x5d6   : > { %3450 = vmatpush1.bf16.msra.mxu0 %v3449_v36 }
 0x5d7   : > { %3464 = vmatprep.subr.bf16.mxu1 %v3463_v39 }
 0x5d8   : > { %3466 = vmatpush1.bf16.msra.mxu1 %v3465_v35 }
 0x5d9   : > { %3245 = vmatmul.mubr.msk.f32.vlgmr.msra.gmra.mrb[80].mxu0 %vm603_vm0, %v3229_v53 }
 0x5da   : > { %2398 = vmatprep.mubr.f32.mxu0 %v4088_v32 }
 0x5db   : > { %3253 = vmatmul.mubr.msk.f32.vlgmr.msra.gmra.mrb[80].mxu1 %vm603_vm0, %v3229_v53 }
 0x5dc   : > { %2511 = vmatprep.mubr.f32.mxu1 %v4088_v32 }
 0x5dd   : > { %3246 = vmatmul.mubr.msk.f32.gmra.mrb[82].mxu0 %vm603_vm0, %v3230_v8 }
 0x5de   : > { %2404 = vmatprep.mubr.f32.mxu0 %v4088_v32 }
 0x5df   : > { %3254 = vmatmul.mubr.msk.f32.gmra.mrb[82].mxu1 %vm603_vm0, %v3230_v8 }
 0x5e0   : > { %2517 = vmatprep.mubr.f32.mxu1 %v4088_v32 }
 0x5e1   : > { %3247 = vmatmul.mubr.msk.f32.gmra.mrb[84].mxu0 %vm603_vm0, %v3231_v22 }
 0x5e2   : > { %2410 = vmatprep.mubr.f32.mxu0 %v4088_v32 }
 0x5e3   : > { %3255 = vmatmul.mubr.msk.f32.gmra.mrb[84].mxu1 %vm603_vm0, %v3231_v22 }
 0x5e4   : > { %2523 = vmatprep.mubr.f32.mxu1 %v4088_v32 }
 0x5e5   : > { %3248 = vmatmul.mubr.msk.f32.gmra.mrb[86].mxu0 %vm603_vm0, %v3232_v62 }
 0x5e6   : > { %2416 = vmatprep.mubr.f32.mxu0 %v4088_v32 }
 0x5e7   : > { %3256 = vmatmul.mubr.msk.f32.gmra.mrb[86].mxu1 %vm603_vm0, %v3232_v62 }
 0x5e8   : > { %2529 = vmatprep.mubr.f32.mxu1 %v4088_v32 }
 0x5e9   : > { %3249 = vmatmul.mubr.msk.f32.gmra.mrb[88].mxu0 %vm603_vm0, %v3233_v16 }
 0x5ea   : > { %2422 = vmatprep.mubr.f32.mxu0 %v4088_v32 }
 0x5eb   : > { %3257 = vmatmul.mubr.msk.f32.gmra.mrb[88].mxu1 %vm603_vm0, %v3233_v16 }
 0x5ec   : > { %2535 = vmatprep.mubr.f32.mxu1 %v4088_v32 }
 0x5ed   : > { %3250 = vmatmul.mubr.msk.f32.gmra.mrb[90].mxu0 %vm603_vm0, %v3234_v56 }
 0x5ee   : > { %2428 = vmatprep.mubr.f32.mxu0 %v4088_v32 }
 0x5ef   : > { %3258 = vmatmul.mubr.msk.f32.gmra.mrb[90].mxu1 %vm603_vm0, %v3234_v56 }
 0x5f0   : > { %2541 = vmatprep.mubr.f32.mxu1 %v4088_v32 }
 0x5f1   : > { %3251 = vmatmul.mubr.msk.f32.gmra.mrb[92].mxu0 %vm603_vm0, %v3235_v23 }
 0x5f2   : > { %2434 = vmatprep.mubr.f32.mxu0 %v4088_v32 }
 0x5f3   : > { %3259 = vmatmul.mubr.msk.f32.gmra.mrb[92].mxu1 %vm603_vm0, %v3235_v23  ;;  %v5023_v23 = vpop.permute.xlu1 %2281 }
 0x5f4   : > { %2547 = vmatprep.mubr.f32.mxu1 %v4088_v32 }
 0x5f5   : > { %3252 = vmatmul.mubr.msk.f32.gmra.mrb[94].mxu0 %vm603_vm0, %v3236_v58 }
 0x5f6   : > { %2754 = vmatprep.mubr.f32.mxu0 %v4088_v32 }
 0x5f7   : > { %3260 = vmatmul.mubr.msk.f32.gmra.mrb[94].mxu1 %vm603_vm0, %v3236_v58 }
 0x5f8   : > { %2843 = vmatprep.mubr.f32.mxu1 %v4088_v32 }
 0x6ac   : > { %v2394_v19 = vpop.f32.mrb[80].mxu0 }
 0x6ad   : > { %v2395_v20 = vadd.f32 %v2394_v19, %v2267_v21  ;;  %v2396_v11 = vpop.f32.mrb[81].mxu0 }
 0x6ae   : > { %v2507_v44 = vpop.f32.mrb[80].mxu1  ;;  %v2397_v57 = vadd.f32 %v2396_v11, %v2267_v21 }
 0x6af   : > { %3863 = vtanh.f32 %v2395_v20  ;;  %v2508_v37 = vadd.f32 %v2507_v44, %v2267_v21  ;;  %v2509_v25 = vpop.f32.mrb[81].mxu1 }
 0x6b0   : > { %3865 = vtanh.f32 %v2397_v57  ;;  %v2510_v33 = vadd.f32 %v2509_v25, %v2267_v21  ;;  %v2400_v2 = vpop.f32.mrb[82].mxu0 }
 0x6b1   : > { %3867 = vtanh.f32 %v2508_v37  ;;  %v2401_v34 = vadd.f32 %v2400_v2, %v2272_v1  ;;  %v2402_v43 = vpop.f32.mrb[83].mxu0 }
 0x6b2   : > { %3869 = vtanh.f32 %v2510_v33  ;;  %v2513_v6 = vpop.f32.mrb[82].mxu1  ;;  %v2403_v36 = vadd.f32 %v2402_v43, %v2272_v1 }
 0x6b3   : > { %3871 = vtanh.f32 %v2401_v34  ;;  %v2514_v13 = vadd.f32 %v2513_v6, %v2272_v1  ;;  %v2515_v48 = vpop.f32.mrb[83].mxu1 }
 0x6b4   : > { %3873 = vtanh.f32 %v2403_v36  ;;  %v2516_v35 = vadd.f32 %v2515_v48, %v2272_v1  ;;  %v2406_v39 = vpop.f32.mrb[84].mxu0 }
 0x6b5   : > { %3875 = vtanh.f32 %v2514_v13  ;;  %v2407_v53 = vadd.f32 %v2406_v39, %v2277_v28  ;;  %v2408_v8 = vpop.f32.mrb[85].mxu0 }
 0x6b6   : > { %3877 = vtanh.f32 %v2516_v35  ;;  %v2519_v22 = vpop.f32.mrb[84].mxu1  ;;  %v2409_v62 = vadd.f32 %v2408_v8, %v2277_v28 }
 0x6b7   : > { %3879 = vtanh.f32 %v2407_v53  ;;  %v2520_v16 = vadd.f32 %v2519_v22, %v2277_v28  ;;  %v2521_v56 = vpop.f32.mrb[85].mxu1 }
 0x6b8   : > { %3881 = vtanh.f32 %v2409_v62  ;;  %v2522_v58 = vadd.f32 %v2521_v56, %v2277_v28  ;;  %v2412_v21 = vpop.f32.mrb[86].mxu0 }
 0x6b9   : > { %v3864_v19 = vpop.eup %3863  ;;  %3883 = vtanh.f32 %v2520_v16  ;;  %v2413_v20 = vadd.f32 %v2412_v21, %v5023_v23  ;;  %v2414_v11 = vpop.f32.mrb[87].mxu0 }
 0x6ba   : > { %v3866_v44 = vpop.eup %3865  ;;  %v2586_v57 = vadd.f32 %v3864_v19, %v4737_v52  ;;  %3885 = vtanh.f32 %v2522_v58  ;;  %v2525_v37 = vpop.f32.mrb[86].mxu1 }
 0x6bb   : > { %v3868_v25 = vpop.eup %3867  ;;  %v2587_v1 = vadd.f32 %v3866_v44, %v4731_v47  ;;  %3887 = vtanh.f32 %v2413_v20  ;;  %v2527_v33 = vpop.f32.mrb[87].mxu1 }
 0x6bc   : > { %v3870_v2 = vpop.eup %3869  ;;  %3889 = vtanh.f32 %v2586_v57  ;;  %v2588_v34 = vadd.f32 %v3868_v25, %v4751_v55  ;;  %v2418_v43 = vpop.f32.mrb[88].mxu0  ;;  %v2526_v57 = vadd.f32 %v2525_v37, %v5023_v23 }
 0x6bd   : > { %v3872_v6 = vpop.eup %3871  ;;  %3891 = vtanh.f32 %v2587_v1  ;;  %v2589_v36 = vadd.f32 %v3870_v2, %v4743_v9  ;;  %v2420_v13 = vpop.f32.mrb[89].mxu0 }
 0x6be   : > { %v3874_v48 = vpop.eup %3873  ;;  %3893 = vtanh.f32 %v2588_v34  ;;  %v2590_v52 = vadd.f32 %v3872_v6, %v4728_v51  ;;  %v2531_v28 = vpop.f32.mrb[88].mxu1 }
 0x6bf   : > { %v3876_v35 = vpop.eup %3875  ;;  %3895 = vtanh.f32 %v2589_v36  ;;  %v2591_v47 = vadd.f32 %v3874_v48, %v4734_v49  ;;  %v2533_v39 = vpop.f32.mrb[89].mxu1 }
 0x6c0   : > { %v3878_v53 = vpop.eup %3877  ;;  %3897 = vtanh.f32 %v2590_v52  ;;  %v2592_v55 = vadd.f32 %v3876_v35, %v4740_v60  ;;  %v2424_v8 = vpop.f32.mrb[90].mxu0 }
 0x6c1   : > { %v3880_v22 = vpop.eup %3879  ;;  %3899 = vtanh.f32 %v2591_v47  ;;  %v2593_v9 = vadd.f32 %v3878_v53, %v4746_v24  ;;  %v2426_v62 = vpop.f32.mrb[91].mxu0 }
 0x6c2   : > { %v3882_v16 = vpop.eup %3881  ;;  %3901 = vtanh.f32 %v2592_v55  ;;  %v2594_v51 = vadd.f32 %v3880_v22, %v4769_v4  ;;  %v2537_v56 = vpop.f32.mrb[90].mxu1 }
 0x6c3   : > { %v3884_v58 = vpop.eup %3883  ;;  %3903 = vtanh.f32 %v2593_v9  ;;  %v2595_v49 = vadd.f32 %v3882_v16, %v4763_v50  ;;  %v2539_v21 = vpop.f32.mrb[91].mxu1  ;;  %v2415_v50 = vadd.f32 %v2414_v11, %v5023_v23 }
 0x6c4   : > { %v3886_v19 = vpop.eup %3885  ;;  %3905 = vtanh.f32 %v2594_v51  ;;  %v2596_v60 = vadd.f32 %v3884_v58, %v4783_v17  ;;  %v2430_v20 = vpop.f32.mrb[92].mxu0  ;;  %v2528_v17 = vadd.f32 %v2527_v33, %v5023_v23 }
 0x6c5   : > { %v3888_v44 = vpop.eup %3887  ;;  %3907 = vtanh.f32 %v2595_v49  ;;  %v2597_v24 = vadd.f32 %v3886_v19, %v4775_v40  ;;  %v5039_v25 = vpop.f32.mrb[93].mxu0 }
 0x6c6   : > { %v3890_v4 = vpop.eup %3889  ;;  %3909 = vtanh.f32 %v2596_v60  ;;  %v2598_v1 = vadd.f32 %v3888_v44, %v4760_v41  ;;  %v2543_v2 = vpop.f32.mrb[92].mxu1 }
 0x6c7   : > { %v3892_v34 = vpop.eup %3891  ;;  %v2287_v6 = vpop.permute.xlu0 %2286  ;;  %3911 = vtanh.f32 %v2597_v24 }
 0x6c8   : > { %v5044_v36 = vpop.f32.mrb[93].mxu1  ;;  %v3894_v48 = vpop.eup %3893  ;;  %3913 = vtanh.f32 %v2598_v1  ;;  %v2419_v40 = vadd.f32 %v2418_v43, %v2287_v6  ;;  %v2532_v35 = vadd.f32 %v2531_v28, %v2287_v6  ;;  %v2421_v11 = vadd.f32 %v2420_v13, %v2287_v6 }
 0x6c9   : > { %v5046_v37 = vpop.f32.mrb[94].mxu0  ;;  %v3896_v52 = vpop.eup %3895  ;;  %3915 = vtanh.f32 %v2526_v57  ;;  %v2534_v23 = vadd.f32 %v2533_v39, %v2287_v6 }
 0x6ca   : > { %v5048_v47 = vpop.f32.mrb[95].mxu0  ;;  %v3898_v41 = vpop.eup %3897  ;;  %3917 = vtanh.f32 %v2415_v50 }
 0x6cb   : > { %v5050_v53 = vpop.f32.mrb[94].mxu1  ;;  %v3900_v55 = vpop.eup %3899  ;;  %3919 = vtanh.f32 %v2528_v17  ;;  %v3469_v9 = vpack.c.bf16 %v3898_v41, %v3890_v4 }
 0x6cc   : > { %v2292_v22 = vpop.permute.xlu1 %2291  ;;  %v5052_v33 = vpop.f32.mrb[95].mxu1  ;;  %3921 = vtanh.f32 %v2419_v40  ;;  %v3467_v51 = vpack.c.bf16 %v3900_v55, %v3892_v34 }
 0x6cd   : > { %v3902_v43 = vpop.eup %3901  ;;  %v2425_v16 = vadd.f32 %v2424_v8, %v2292_v22  ;;  %3923 = vtanh.f32 %v2532_v35  ;;  %v2538_v28 = vadd.f32 %v2537_v56, %v2292_v22  ;;  %v2427_v13 = vadd.f32 %v2426_v62, %v2292_v22  ;;  %v2297_v39 = vpop.permute.xlu0 %2296 }
 0x6ce   : > { %v3904_v58 = vpop.eup %3903  ;;  %v3485_v49 = vpack.c.bf16 %v3902_v43, %v3894_v48  ;;  %3925 = vtanh.f32 %v2421_v11  ;;  %3468 = vmatprep.subr.bf16.mxu0 %v3467_v51  ;;  %v2540_v24 = vadd.f32 %v2539_v21, %v2292_v22  ;;  %v2431_v8 = vadd.f32 %v2430_v20, %v2297_v39 }
 0x6cf   : > { %v5054_v19 = vpop.eup %3905  ;;  %v3483_v60 = vpack.c.bf16 %v3904_v58, %v3896_v52  ;;  %3927 = vtanh.f32 %v2534_v23  ;;  %3470 = vmatpush1.bf16.msra.mxu0 %v3469_v9  ;;  %v2544_v56 = vadd.f32 %v2543_v2, %v2297_v39 }
 0x6d0   : > { %v5056_v44 = vpop.eup %3907  ;;  %3929 = vtanh.f32 %v2425_v16  ;;  %v2302_v51 = vpop.permute.xlu1 %2301 }
 0x6d1   : > { %v5058_v57 = vpop.eup %3909  ;;  %3484 = vmatprep.subr.bf16.mxu1 %v3483_v60  ;;  %3931 = vtanh.f32 %v2538_v28 }
 0x6d2   : > { %v5060_v4 = vpop.eup %3911  ;;  %3486 = vmatpush1.bf16.msra.mxu1 %v3485_v49  ;;  %3933 = vtanh.f32 %v2427_v13  ;;  %v2439_v13 = vadd.f32 %v5048_v47, %v2302_v51 }
 0x6d3   : > { %v3914_v1 = vpop.eup %3913  ;;  %3935 = vtanh.f32 %v2540_v24 }
 0x6d4   : > { %v3916_v62 = vpop.eup %3915  ;;  %v3473_v50 = vpack.c.bf16 %v3914_v1, %v5054_v19  ;;  %3937 = vtanh.f32 %v2431_v8 }
 0x6d5   : > { %v3918_v34 = vpop.eup %3917  ;;  %v2600_v21 = vadd.f32 %v3916_v62, %v4772_v63  ;;  %3939 = vtanh.f32 %v2544_v56 }
 0x6d6   : > { %v3920_v6 = vpop.eup %3919  ;;  %v2599_v17 = vadd.f32 %v3918_v34, %v4766_v18 }
 0x6d7   : > { %v3922_v20 = vpop.eup %3921  ;;  %3941 = vtanh.f32 %v2600_v21  ;;  %v2601_v48 = vadd.f32 %v3920_v6, %v4778_v54 }
 0x6d8   : > { %v3924_v2 = vpop.eup %3923  ;;  %3943 = vtanh.f32 %v2599_v17  ;;  %v2602_v40 = vadd.f32 %v3922_v20, %v4801_v45 }
 0x6d9   : > { %v3926_v52 = vpop.eup %3925  ;;  %3945 = vtanh.f32 %v2601_v48  ;;  %v2604_v35 = vadd.f32 %v3924_v2, %v4815_v42 }
 0x6da   : > { %v3928_v41 = vpop.eup %3927  ;;  %3947 = vtanh.f32 %v2602_v40  ;;  %v2603_v63 = vadd.f32 %v3926_v52, %v4795_v38 }
 0x6db   : > { %v3930_v11 = vpop.eup %3929  ;;  %3949 = vtanh.f32 %v2604_v35  ;;  %v2605_v18 = vadd.f32 %v3928_v41, %v4807_v12  ;;  %v2433_v12 = vadd.f32 %v5039_v25, %v2297_v39 }
 0x6dc   : > { %v3932_v55 = vpop.eup %3931  ;;  %3951 = vtanh.f32 %v2603_v63  ;;  %v2606_v54 = vadd.f32 %v3930_v11, %v4792_v10  ;;  %v2546_v10 = vadd.f32 %v5044_v36, %v2297_v39  ;;  %v2552_v36 = vadd.f32 %v5052_v33, %v2302_v51 }
 0x6dd   : > { %v3934_v22 = vpop.eup %3933  ;;  %3953 = vtanh.f32 %v2605_v18  ;;  %v2608_v45 = vadd.f32 %v3932_v55, %v4804_v46  ;;  %v2437_v46 = vadd.f32 %v5046_v37, %v2302_v51 }
 0x6de   : > { %v3936_v23 = vpop.eup %3935  ;;  %3955 = vtanh.f32 %v2606_v54  ;;  %v2607_v42 = vadd.f32 %v3934_v22, %v4798_v15  ;;  %v2550_v15 = vadd.f32 %v5050_v53, %v2302_v51  ;;  %v2652_v22 = vld [vmem:[%s5173_s5 + $0x10] sm:$0xff] }
 0x6df   : > { %v3938_v9 = vpop.eup %3937  ;;  %3957 = vtanh.f32 %v2608_v45  ;;  %v2609_v38 = vadd.f32 %v3936_v23, %v4810_v31  ;;  %v2653_v45 = vld [vmem:[%s5173_s5 + $0x18] sm:$0xff]  ;;  %v2661_v23 = vpop.permute.xlu0 %2660 }
 0x6e0   : > { %v3940_v43 = vpop.eup %3939  ;;  %3959 = vtanh.f32 %v2607_v42 }
 0x6e1   : > { %v3942_v16 = vpop.eup %3941  ;;  %3961 = vtanh.f32 %v2609_v38  ;;  %v2612_v33 = vadd.f32 %v3940_v43, %v4847_v26 }
 0x6e2   : > { %v3944_v58 = vpop.eup %3943  ;;  %v3489_v28 = vpack.c.bf16 %v3942_v16, %v5058_v57  ;;  %3963 = vtanh.f32 %v2433_v12 }
 0x6e3   : > { %v3946_v49 = vpop.eup %3945  ;;  %v3471_v19 = vpack.c.bf16 %v3944_v58, %v5056_v44  ;;  %3965 = vtanh.f32 %v2546_v10  ;;  %v2666_v58 = vpop.permute.xlu1 %2665 }
 0x6e4   : > { %v3948_v31 = vpop.eup %3947  ;;  %v3487_v25 = vpack.c.bf16 %v3946_v49, %v5060_v4  ;;  %3967 = vtanh.f32 %v2437_v46  ;;  %v2610_v4 = vadd.f32 %v3938_v9, %v4833_v14 }
 0x6e5   : > { %v3950_v60 = vpop.eup %3949  ;;  %3472 = vmatprep.subr.bf16.mxu0 %v3471_v19  ;;  %3969 = vtanh.f32 %v2550_v15 }
 0x6e6   : > { %v3952_v39 = vpop.eup %3951  ;;  %3488 = vmatprep.subr.bf16.mxu1 %v3487_v25  ;;  %3474 = vmatpush1.bf16.msra.mxu0 %v3473_v50  ;;  %3971 = vtanh.f32 %v2439_v13  ;;  %v2671_v25 = vpop.permute.xlu0 %2670 }
 0x6e7   : > { %v3954_v37 = vpop.eup %3953  ;;  %3490 = vmatpush1.bf16.msra.mxu1 %v3489_v28  ;;  %3973 = vtanh.f32 %v2552_v36 }
 0x6e8   : > { %v3956_v53 = vpop.eup %3955  ;;  %3975 = vtanh.f32 %v2610_v4 }
 0x6e9   : > { %v3958_v44 = vpop.eup %3957  ;;  %v3477_v24 = vpack.c.bf16 %v3956_v53, %v3948_v31  ;;  %3977 = vtanh.f32 %v2612_v33 }
 0x6ea   : > { %v3960_v47 = vpop.eup %3959  ;;  %v3493_v57 = vpack.c.bf16 %v3958_v44, %v3950_v60 }
 0x6eb   : > { %v3962_v8 = vpop.eup %3961  ;;  %v3475_v56 = vpack.c.bf16 %v3960_v47, %v3952_v39  ;;  %v2676_v47 = vpop.permute.xlu1 %2675 }
 0x6ec   : > { %v3491_v1 = vpack.c.bf16 %v3962_v8, %v3954_v37  ;;  %v3964_v62 = vpop.eup %3963 }
 0x6ed   : > { %3476 = vmatprep.subr.bf16.mxu0 %v3475_v56  ;;  %v3966_v50 = vpop.eup %3965  ;;  %v2611_v34 = vadd.f32 %v3964_v62, %v4827_v7 }
 0x6ee   : > { %3492 = vmatprep.subr.bf16.mxu1 %v3491_v1  ;;  %3478 = vmatpush1.bf16.msra.mxu0 %v3477_v24  ;;  %v3968_v21 = vpop.eup %3967  ;;  %v2613_v6 = vadd.f32 %v3966_v50, %v4839_v29 }
 0x6ef   : > { %3494 = vmatpush1.bf16.msra.mxu1 %v3493_v57  ;;  %v3970_v17 = vpop.eup %3969  ;;  %3979 = vtanh.f32 %v2611_v34  ;;  %v2614_v14 = vadd.f32 %v3968_v21, %v4824_v59 }
 0x6f0   : > { %v3972_v20 = vpop.eup %3971  ;;  %3981 = vtanh.f32 %v2613_v6  ;;  %v2616_v26 = vadd.f32 %v3970_v17, %v4836_v5  ;;  %v2891_v17 = vpop.permute.xlu0 %2890 }
 0x6f1   : > { %v3974_v48 = vpop.eup %3973  ;;  %3983 = vtanh.f32 %v2614_v14  ;;  %v2615_v2 = vadd.f32 %v3972_v20, %v4830_v27  ;;  %v2650_v27 = vld [vmem:[%s5173_s5] sm:$0xff] }
 0x6f2   : > { %3985 = vtanh.f32 %v2616_v26  ;;  %v2617_v7 = vadd.f32 %v3974_v48, %v4842_v30  ;;  %v3976_v40 = vpop.eup %3975  ;;  %v2651_v30 = vld [vmem:[%s5173_s5 + $0x8] sm:$0xff]  ;;  %v2896_v48 = vpop.permute.xlu1 %2895 }
 0x6f3   : > { %3987 = vtanh.f32 %v2615_v2  ;;  %v3978_v52 = vpop.eup %3977 }
 0x6f4   : > { %3989 = vtanh.f32 %v2617_v7 }
 0x6f9   : > { %v3980_v29 = vpop.eup %3979 }
 0x6fa   : > { %v3982_v35 = vpop.eup %3981 }
 0x6fb   : > { %v3984_v41 = vpop.eup %3983 }
 0x6fc   : > { %v3986_v63 = vpop.eup %3985  ;;  %v3481_v59 = vpack.c.bf16 %v3984_v41, %v3976_v40 }
 0x6fd   : > { %v3988_v11 = vpop.eup %3987  ;;  %v3497_v18 = vpack.c.bf16 %v3986_v63, %v3978_v52 }
 0x6fe   : > { %v3990_v55 = vpop.eup %3989  ;;  %v3479_v5 = vpack.c.bf16 %v3988_v11, %v3980_v29 }
 0x6ff   : > { %v3495_v54 = vpack.c.bf16 %v3990_v55, %v3982_v35  ;;  %v2901_v55 = vpop.permute.xlu0 %2900 }
 0x700   : > { %3480 = vmatprep.subr.bf16.mxu0 %v3479_v5 }
 0x701   : > { %3496 = vmatprep.subr.bf16.mxu1 %v3495_v54  ;;  %3482 = vmatpush1.bf16.msra.mxu0 %v3481_v59 }
 0x702   : > { %3498 = vmatpush1.bf16.msra.mxu1 %v3497_v18 }
 0x704   : > { %3261 = vmatmul.mubr.msk.f32.vlgmr.msra.gmra.mrb[96].mxu0 %vm603_vm0, %v2650_v27 }
 0x705   : > { %3265 = vmatmul.mubr.msk.f32.vlgmr.msra.gmra.mrb[96].mxu1 %vm603_vm0, %v2650_v27  ;;  %2760 = vmatprep.mubr.f32.mxu0 %v4088_v32 }
 0x706   : > { %2849 = vmatprep.mubr.f32.mxu1 %v4088_v32 }
 0x708   : > { %3262 = vmatmul.mubr.msk.f32.gmra.mrb[98].mxu0 %vm603_vm0, %v2651_v30 }
 0x709   : > { %3266 = vmatmul.mubr.msk.f32.gmra.mrb[98].mxu1 %vm603_vm0, %v2651_v30  ;;  %2766 = vmatprep.mubr.f32.mxu0 %v4088_v32 }
 0x70a   : > { %2855 = vmatprep.mubr.f32.mxu1 %v4088_v32 }
 0x70c   : > { %3263 = vmatmul.mubr.msk.f32.gmra.mrb[100].mxu0 %vm603_vm0, %v2652_v22 }
 0x70d   : > { %3267 = vmatmul.mubr.msk.f32.gmra.mrb[100].mxu1 %vm603_vm0, %v2652_v22  ;;  %2772 = vmatprep.mubr.f32.mxu0 %v4088_v32 }
 0x70e   : > { %2861 = vmatprep.mubr.f32.mxu1 %v4088_v32 }
 0x710   : > { %3264 = vmatmul.mubr.msk.f32.gmra.mrb[102].mxu0 %vm603_vm0, %v2653_v45 }
 0x711   : > { %3268 = vmatmul.mubr.msk.f32.gmra.mrb[102].mxu1 %vm603_vm0, %v2653_v45 }
 0x7d7   : > { %v2756_v42 = vpop.f32.mrb[96].mxu0 }
 0x7d8   : > { %v2757_v9 = vadd.f32 %v2756_v42, %v2661_v23  ;;  %v2845_v38 = vpop.f32.mrb[96].mxu1  ;;  %v2758_v43 = vpop.f32.mrb[97].mxu0 }
 0x7d9   : > { %v2846_v12 = vadd.f32 %v2845_v38, %v2661_v23  ;;  %v2759_v16 = vadd.f32 %v2758_v43, %v2661_v23  ;;  %v2847_v51 = vpop.f32.mrb[97].mxu1 }
 0x7da   : > { %3991 = vtanh.f32 %v2757_v9  ;;  %v2848_v10 = vadd.f32 %v2847_v51, %v2661_v23  ;;  %v2906_v51 = vpop.permute.xlu1 %2905 }
 0x7db   : > { %3993 = vtanh.f32 %v2846_v12  ;;  %v2762_v46 = vpop.f32.mrb[98].mxu0 }
 0x7dc   : > { %3995 = vtanh.f32 %v2759_v16  ;;  %v2763_v28 = vadd.f32 %v2762_v46, %v2666_v58  ;;  %v2851_v32 = vpop.f32.mrb[98].mxu1  ;;  %v2764_v49 = vpop.f32.mrb[99].mxu0 }
 0x7dd   : > { %3997 = vtanh.f32 %v2848_v10  ;;  %v2852_v15 = vadd.f32 %v2851_v32, %v2666_v58  ;;  %v2765_v19 = vadd.f32 %v2764_v49, %v2666_v58  ;;  %v2853_v31 = vpop.f32.mrb[99].mxu1 }
 0x7de   : > { %3999 = vtanh.f32 %v2763_v28  ;;  %v2854_v13 = vadd.f32 %v2853_v31, %v2666_v58 }
 0x7df   : > { %4001 = vtanh.f32 %v2852_v15  ;;  %v2768_v60 = vpop.f32.mrb[100].mxu0 }
 0x7e0   : > { %4003 = vtanh.f32 %v2765_v19  ;;  %v2769_v36 = vadd.f32 %v2768_v60, %v2671_v25  ;;  %v2857_v39 = vpop.f32.mrb[100].mxu1  ;;  %v2770_v37 = vpop.f32.mrb[101].mxu0 }
 0x7e1   : > { %4005 = vtanh.f32 %v2854_v13  ;;  %v2858_v53 = vadd.f32 %v2857_v39, %v2671_v25  ;;  %v2771_v44 = vadd.f32 %v2770_v37, %v2671_v25  ;;  %v2859_v24 = vpop.f32.mrb[101].mxu1 }
 0x7e2   : > { %4007 = vtanh.f32 %v2769_v36  ;;  %v2860_v57 = vadd.f32 %v2859_v24, %v2671_v25 }
 0x7e3   : > { %4009 = vtanh.f32 %v2858_v53  ;;  %v2774_v8 = vpop.f32.mrb[102].mxu0 }
 0x7e4   : > { %v3992_v4 = vpop.eup %3991  ;;  %4011 = vtanh.f32 %v2771_v44  ;;  %v2775_v56 = vadd.f32 %v2774_v8, %v2676_v47  ;;  %v2863_v33 = vpop.f32.mrb[102].mxu1 }
 0x7e5   : > { %v2776_v1 = vpop.f32.mrb[103].mxu0  ;;  %v3994_v62 = vpop.eup %3993  ;;  %4013 = vtanh.f32 %v2860_v57  ;;  %v2864_v50 = vadd.f32 %v2863_v33, %v2676_v47  ;;  %v2908_v7 = vmul.f32 %v3992_v4, %v2891_v17 }
 0x7e6   : > { %v2777_v34 = vadd.f32 %v2776_v1, %v2676_v47  ;;  %v2865_v21 = vpop.f32.mrb[103].mxu1  ;;  %v3996_v6 = vpop.eup %3995  ;;  %4015 = vtanh.f32 %v2775_v56  ;;  %v2910_v29 = vmul.f32 %v3994_v62, %v2891_v17 }
 0x7e7   : > { %v2866_v14 = vadd.f32 %v2865_v21, %v2676_v47  ;;  %v3998_v20 = vpop.eup %3997  ;;  %4017 = vtanh.f32 %v2864_v50  ;;  %v2909_v63 = vmul.f32 %v3996_v6, %v2891_v17  ;;  %v2964_v6 = vpop.permute.xlu0 %2963 }
 0x7e8   : > { %v4000_v26 = vpop.eup %3999  ;;  %4019 = vtanh.f32 %v2777_v34  ;;  %v2911_v5 = vmul.f32 %v3998_v20, %v2891_v17  ;;  %v4089_v34 = vmov 1966171168  }
 0x7e9   : > { %v4002_v2 = vpop.eup %4001  ;;  %v2912_v40 = vmul.f32 %v4000_v26, %v2896_v48  ;;  %4021 = vtanh.f32 %v2866_v14  ;;  %v2981_v21 = vunpack.c.l.s4 %v4089_v34 }
 0x7ea   : > { %v4004_v52 = vpop.eup %4003  ;;  %v2914_v35 = vmul.f32 %v4002_v2, %v2896_v48 }
 0x7eb   : > { %v4006_v41 = vpop.eup %4005  ;;  %v2924_v59 = vadd.f32 %v2912_v40, %v2908_v7  ;;  %v2913_v11 = vmul.f32 %v4004_v52, %v2896_v48  ;;  %v2969_v7 = vrot.slane %v2964_v6, %v385_v3 }
 0x7ec   : > { %v4008_v18 = vpop.eup %4007  ;;  %v2942_v54 = vadd.f32 %v2914_v35, %v2910_v29  ;;  %v2915_v27 = vmul.f32 %v4006_v41, %v2896_v48  ;;  %v2982_v29 = vunpack.c.0.s8 %v2981_v21 }
 0x7ed   : > { %v4010_v30 = vpop.eup %4009  ;;  %v2933_v22 = vadd.f32 %v2913_v11, %v2909_v63  ;;  %v2916_v45 = vmul.f32 %v4008_v18, %v2901_v55 }
 0x7ee   : > { %v4012_v23 = vpop.eup %4011  ;;  %v2951_v42 = vadd.f32 %v2915_v27, %v2911_v5  ;;  %v2918_v9 = vmul.f32 %v4010_v30, %v2901_v55  ;;  %v2985_v5 = vsub.s32 %v2982_v29, %v4376_v0 }
 0x7ef   : > { %v4014_v38 = vpop.eup %4013  ;;  %v2925_v43 = vadd.f32 %v2924_v59, %v2916_v45  ;;  %v2917_v12 = vmul.f32 %v4012_v23, %v2901_v55 }
 0x7f0   : > { %v4016_v16 = vpop.eup %4015  ;;  %v2943_v10 = vadd.f32 %v2942_v54, %v2918_v9  ;;  %v2919_v58 = vmul.f32 %v4014_v38, %v2901_v55 }
 0x7f1   : > { %v4018_v46 = vpop.eup %4017  ;;  %v2934_v28 = vadd.f32 %v2933_v22, %v2917_v12  ;;  %v2920_v32 = vmul.f32 %v4016_v16, %v2906_v51 }
 0x7f2   : > { %v4020_v49 = vpop.eup %4019  ;;  %v2952_v15 = vadd.f32 %v2951_v42, %v2919_v58  ;;  %v2922_v19 = vmul.f32 %v4018_v46, %v2906_v51 }
 0x7f3   : > { %v4022_v31 = vpop.eup %4021  ;;  %v2926_v13 = vadd.f32 %v2925_v43, %v2920_v32  ;;  %v2921_v25 = vmul.f32 %v4020_v49, %v2906_v51 }
 0x7f4   : > { %v2944_v60 = vadd.f32 %v2943_v10, %v2922_v19  ;;  %v2923_v36 = vmul.f32 %v4022_v31, %v2906_v51 }
 0x7f5   : > { %v2927_v39 = vrot.slane %v2926_v13, 4  ;;  %v2935_v37 = vadd.f32 %v2934_v28, %v2921_v25 }
 0x7f6   : > { %v2945_v53 = vrot.slane %v2944_v60, 4  ;;  %v2953_v44 = vadd.f32 %v2952_v15, %v2923_v36 }
 0x7f7   : > { %v2928_v24 = vadd.f32 %v2927_v39, %v2926_v13  ;;  %v2936_v47 = vrot.slane %v2935_v37, 4 }
 0x7f8   : > { %v2946_v57 = vadd.f32 %v2945_v53, %v2944_v60  ;;  %v2954_v8 = vrot.slane %v2953_v44, 4 }
 0x7f9   : > { %v2929_v4 = vrot.slane %v2928_v24, 2  ;;  %v2937_v56 = vadd.f32 %v2936_v47, %v2935_v37 }
 0x7fa   : > { %v2947_v33 = vrot.slane %v2946_v57, 2  ;;  %v2955_v1 = vadd.f32 %v2954_v8, %v2953_v44 }
 0x7fb   : > { %v2930_v62 = vadd.f32 %v2929_v4, %v2928_v24  ;;  %v2938_v50 = vrot.slane %v2937_v56, 2 }
 0x7fc   : > { %v2948_v17 = vadd.f32 %v2947_v33, %v2946_v57  ;;  %v2956_v14 = vrot.slane %v2955_v1, 2 }
 0x7fd   : > { %v2939_v20 = vadd.f32 %v2938_v50, %v2937_v56  ;;  %v2931_v26 = vrot.slane %v2930_v62, 1 }
 0x7fe   : > { %v2957_v48 = vadd.f32 %v2956_v14, %v2955_v1  ;;  %v2949_v2 = vrot.slane %v2948_v17, 1 }
 0x7ff   : > { %v2932_v40 = vadd.f32 %v2931_v26, %v2930_v62  ;;  %v2940_v52 = vrot.slane %v2939_v20, 1 }
 0x800   : > { %v2950_v35 = vadd.f32 %v2949_v2, %v2948_v17  ;;  %v2958_v41 = vrot.slane %v2957_v48, 1 }
 0x801   : > { %v2941_v63 = vadd.f32 %v2940_v52, %v2939_v20  ;;  %v2970_v59 = vadd.f32 %v2969_v7, %v2932_v40 }
 0x802   : > { %v2959_v11 = vadd.f32 %v2958_v41, %v2957_v48  ;;  %v2972_v18 = vadd.f32 %v2969_v7, %v2950_v35 }
 0x803   : > { %v2971_v55 = vadd.f32 %v2969_v7, %v2941_v63 }
 0x804   : > { %v2973_v54 = vadd.f32 %v2969_v7, %v2959_v11 }
 0x805   : > { %v2978_v27 = vcombine.low %v2970_v59, %v2971_v55 }
 0x806   : > { %v2979_v30 = vcombine.low %v2972_v18, %v2973_v54 }
 0x807   : > { %v2986_v3 = vrot.slane %v2978_v27, %v2985_v5 }
 0x808   : > { %v2993_v22 = vrot.slane %v2979_v30, %v2985_v5 }
 0x80a   : > { %v2994_v45 = vcombine.low %v2986_v3, %v2993_v22 }
 0x80c   : > { %v3001_v23 = vrot.slane %v2994_v45, %v2985_v5 }
 0x80e   : > { %3007 = vst.msk [vmem:[%s326_s10] sm:$0xf] %vm3005_vm1, %v3001_v23 }
 0x80f   : > { %4036 = shalt.err (!%p4033_p3)
}
 0x810   : > { %s4037_s26 = scalar_lea.hbm %s5126_s22, 64  ;;  %s4041_s29 = scalar_lea.hbm %s5177_s9, 128 }
 0x811   : > { %p4038_p4 = scmp.ne.s32.totalorder %s5126_s22, %s4037_s26  ;;  %p4042_p9 = scmp.lt.u32.totalorder %s5126_s22, %s5177_s9 }
 0x812   : > { %p4043_p10 = scmp.lt.u32.totalorder %s4041_s29, %s4037_s26  ;;  %p4045_p12 = scmp.lt.u32.totalorder %s4037_s26, %s5126_s22 }
 0x813   : > { %p4039_p7 = pnand %p4038_p4, %p4182_p5 }
 0x814   : > { %p4044_p11 = por %p4043_p10, %p4042_p9 }
 0x815   : > { %p4040_p8 = pneg %p4039_p7 }
 0x816   : > { %p4046_p13 = por %p4045_p12, %p4044_p11 }
 0x818   : > { %p4047_p0 = pnand %p4046_p13, %p4040_p8 }
 0x81a   : > { %4050 = shalt.err (!%p4047_p0)
}
 0x81b   : > { %3499 = dma.vmem_to_hbm [thread:$0]  (%p4182_p5), %s5128_s15, 64, %s5126_s22, %s3009_s23  }
 0x81c PF: > { %p3505_p1 = scmp.ge.s32.totalorder %s4085_s14, 2  ;;  %s3035_s18 = sand.u32 1, %s4073_s11  }
 0x81d   : > { %s3036_s24 = scalar_lea.sflag [#allocation4], %s3035_s18 }
 0x81e   : > { %p3502_p2 = pnand %p3505_p1, %p4186_p6 }
 0x820   : > { %4068 = dma.done.wait (!%p3502_p2), %s3036_s24, 64  }
 0x821   : > { %4070 = vsyncadd (!%p3502_p2), %s3036_s24, 4294967232  ;;  %p21_p3 = scmp.ge.s32.totalorder %s4169_s16, 4   ;;  %s5180_s11 = smov %s4077_s12 }
 0x822   : > { %s5181_s12 = smov %s4081_s13  ;;  %s5182_s13 = smov %s4180_s19 }
 0x823   : > { %s5183_s14 = smov %s4169_s16  ;;  %23 = sbr.rel (!%p21_p3) target bundleno = 6 (0x6), region = 101 }
 0x82a   :  { %3041 = vsyncpa [#allocation4], 1 }
 0x82b   :  { %3043 = vsyncpa [#allocation4 + $0x1], 1 }

</bundles_post_ra>
